<compile_context>
chip_gen: v7x
topology: tpu7x:2x2x1
jax: 0.10.0
libtpu: 0.0.40
codegen_flags: <defaults>
</compile_context>

<pallas_src>
import jax
import jax.numpy as jnp
from jax.experimental import pallas as pl
from jax.experimental.pallas import tpu as pltpu

LANE = 128  # TPU lane width; channels are padded to a multiple of this


def _round_up(x, m):
    return ((x + m - 1) // m) * m


# ----------------------------------------------------------------------------
# Static index bookkeeping for the phase-split 3x3 conv
# ----------------------------------------------------------------------------
def _mm_ranges(s, TR):
    """Per row-phase qr: inclusive [lo, hi] range of y1-scratch rows conv2 reads."""
    ranges = []
    for qr in range(s):
        los, his = [], []
        for dy in range(3):
            if (dy - 1) % s == qr:
                mr = (dy - 1) // s
                los.append(1 + mr)
                his.append(TR + mr)
        ranges.append((min(los), max(his)))
    return ranges


def _oob_rows(s, H, TR, jb, mm_ranges):
    """(qr, mm) scratch rows whose source image row falls outside [0, H) at block jb."""
    rows = []
    for qr in range(s):
        lo, hi = mm_ranges[qr]
        for mm in range(lo, hi + 1):
            iy = s * (jb * TR + mm - 1) + qr
            if iy < 0 or iy >= H:
                rows.append((qr, mm))
    return rows


# ----------------------------------------------------------------------------
# Fused kernel (factory, so the downsample branch changes the signature)
# ----------------------------------------------------------------------------
def _make_kernel(*, s, Wo, TR, Jo, has_downsample, mm_ranges, top_zero, bot_zero):
    SS = s * s

    def kernel(*refs):
        if has_downsample:
            (x_ref, w1_ref, b1_ref, w2_ref, b2_ref, w3_ref, b3_ref,
             wd_ref, bd_ref, o_ref, y1s_ref) = refs
        else:
            (x_ref, w1_ref, b1_ref, w2_ref, b2_ref, w3_ref, b3_ref,
             o_ref, y1s_ref) = refs
            wd_ref = bd_ref = None

        j = pl.program_id(1)
        Cpi = x_ref.shape[-1]      # padded in-channels
        Cp = w3_ref.shape[-1]      # padded out-channels

        # --- conv2's pad=1 halo: zero only the left/right halo columns every
        #     step (the interior is fully overwritten by conv1 each step).
        for p in range(SS):
            y1s_ref[p, :, 0:1, :] = jnp.zeros((TR + 2, 1, Cp), jnp.float32)
            y1s_ref[p, :, Wo + 1:Wo + 2, :] = jnp.zeros((TR + 2, 1, Cp), jnp.float32)

        # --- conv1 (1x1) + bn1 + relu: ONE MXU matmul per (row, col) phase ---
        for qr in range(s):
            lo, hi = mm_ranges[qr]
            nrow = hi - lo + 1
            for qc in range(s):
                p = qr * s + qc
                base = p * (TR + 2)
                slab = x_ref[0, 0, base + lo:base + lo + nrow, :, :]    # (nrow, Wo, Cpi)
                a = slab.reshape(nrow * Wo, Cpi).astype(jnp.bfloat16)
                y = jnp.dot(a, w1_ref[...], preferred_element_type=jnp.float32)
                y = jnp.maximum(y + b1_ref[...], 0.0)
                y1s_ref[p, lo:lo + nrow, 1:Wo + 1, :] = y.reshape(nrow, Wo, Cp)

        # --- zero y1 rows whose source row lies outside the image (pad=1) ---
        if top_zero:
            @pl.when(j == 0)
            def _():
                for qr, mm in top_zero:
                    for qc in range(s):
                        y1s_ref[qr * s + qc, mm, :, :] = jnp.zeros((Wo + 2, Cp),
                                                                   jnp.float32)
        if bot_zero:
            @pl.when(j == Jo - 1)
            def _():
                for qr, mm in bot_zero:
                    for qc in range(s):
                        y1s_ref[qr * s + qc, mm, :, :] = jnp.zeros((Wo + 2, Cp),
                                                                   jnp.float32)

        # --- conv2 (3x3, stride s, pad 1) + bn2: 9 tap matmuls, value accumulation ---
        acc = None
        for dy in range(3):
            mr, qr = (dy - 1) // s, (dy - 1) % s
            for dx in range(3):
                mc, qc = (dx - 1) // s, (dx - 1) % s
                patch = y1s_ref[qr * s + qc,
                                1 + mr:1 + mr + TR,
                                1 + mc:1 + mc + Wo, :]                   # (TR, Wo, Cp)
                d = jnp.dot(patch.reshape(TR * Wo, Cp).astype(jnp.bfloat16),
                            w2_ref[dy, dx], preferred_element_type=jnp.float32)
                acc = d if acc is None else acc + d
        y2 = acc + b2_ref[...]          # NB: no relu after bn2 (matches the module)

        # --- conv3 (1x1) + bn3 ---
        y3 = jnp.dot(y2.astype(jnp.bfloat16), w3_ref[...],
                     preferred_element_type=jnp.float32) + b3_ref[...]

        # --- identity / downsample: strided rows are contiguous in phase 0 ---
        xid = x_ref[0, 0, 1:TR + 1, :, :]                                # (TR, Wo, Cpi)
        if has_downsample:
            ident = jnp.dot(xid.reshape(TR * Wo, Cpi).astype(jnp.bfloat16),
                            wd_ref[...], preferred_element_type=jnp.float32) + bd_ref[...]
        else:
            ident = xid.reshape(TR * Wo, Cp)       # Cpi == Cp; exact f32 pass-through

        # --- residual add + relu; lane-dense output store ---
        out = jnp.maximum(y3 + ident, 0.0)
        o_ref[...] = out.reshape(1, TR, Wo, Cp).astype(o_ref.dtype)

    return kernel


# ----------------------------------------------------------------------------
# Host-side helpers
# ----------------------------------------------------------------------------
def _fold_and_pad_params(p, Cin, Cout, Cpi, Cp, has_downsample):
    """Fold BN scales into conv weights, zero-pad channels, cast weights to bf16."""
    def pad_w(w, rows):
        out = jnp.zeros((rows, Cp), jnp.float32).at[:w.shape[0], :w.shape[1]].set(w)
        return out.astype(jnp.bfloat16)

    def pad_b(b):
        return jnp.zeros((1, Cp), jnp.float32).at[0, :Cout].set(b)

    fp = {
        "w1": pad_w(p["w1"] * p["s1"][None, :], Cpi),
        "b1": pad_b(p["b1"]),
        "w2": jnp.zeros((3, 3, Cp, Cp), jnp.float32)
                 .at[:, :, :Cout, :Cout].set(p["w2"] * p["s2"][None, None, None, :])
                 .astype(jnp.bfloat16),
        "b2": pad_b(p["b2"]),
        "w3": pad_w(p["w3"] * p["s3"][None, :], Cp),
        "b3": pad_b(p["b3"]),
    }
    if has_downsample:
        fp["wd"] = pad_w(p["wd"] * p["sd"][None, :], Cpi)
        fp["bd"] = pad_b(p["bd"])
    return fp


def _vmem_capacity_bytes():
    try:
        kind = jax.devices()[0].device_kind.lower()
    except Exception:
        kind = ""
    return (64 if "v7" in kind else 128) * 1024 * 1024


def _vmem_estimate_bytes(s, TR, Wo, Cpi, Cp, has_ds):
    ss = s * s
    x_blk = 2 * ss * (TR + 2) * Wo * Cpi * 4                        # dbl-buffered image block
    w_b = (Cpi * Cp + 9 * Cp * Cp + Cp * Cp + (Cpi * Cp if has_ds else 0)) * 2  # bf16
    b_b = (4 if has_ds else 3) * Cp * 4
    wts = 2 * (w_b + b_b)                                           # default double buffering
    y1s = ss * (TR + 2) * (Wo + 2) * Cp * 4                         # f32 scratch
    out_blk = 2 * TR * Wo * Cp * 4
    tmp = 8 * TR * Wo * Cp * 4                                      # live f32 temporaries
    return x_blk + wts + y1s + out_blk + tmp


def _pick_row_tile(N, Ho, s, Wo, Cpi, Cp, has_ds, budget):
    """Largest TR dividing Ho whose TOTAL VMEM estimate fits, preferring >= 2
    parallel grid steps (megacore / dual-TC)."""
    divisors = [d for d in range(1, Ho + 1) if Ho % d == 0]
    fitting = [d for d in divisors
               if _vmem_estimate_bytes(s, d, Wo, Cpi, Cp, has_ds) <= budget]
    if not fitting:
        return 1   # TODO(synk): add an output-channel grid axis for very large Cp
    tr = max(fitting)
    if N * (Ho // tr) < 2:
        multi = [d for d in fitting if N * (Ho // d) >= 2]
        if multi:
            tr = max(multi)
    return tr


# ----------------------------------------------------------------------------
# Public wrapper
# ----------------------------------------------------------------------------
def residual_block(x_nchw, params, *, stride):
    """Pallas implementation of ResidualBlock.forward. Input/output NCHW."""
    x = jnp.transpose(x_nchw, (0, 2, 3, 1)).astype(jnp.float32)     # -> NHWC
    N, H, W, Cin = x.shape
    Cout = params["w1"].shape[1]
    s = int(stride)
    assert s in (1, 2), "ResNet blocks use stride 1 or 2"
    assert W % s == 0, "W must be divisible by the stride"
    Wo = W // s
    Ho = (H - 1) // s + 1
    Cp = _round_up(Cout, LANE)
    Cpi = _round_up(Cin, LANE)
    has_downsample = (s != 1) or (Cin != Cout)
    if not has_downsample:
        assert Cpi == Cp

    fp = _fold_and_pad_params(params, Cin, Cout, Cpi, Cp, has_downsample)

    capacity = _vmem_capacity_bytes()
    TR = _pick_row_tile(N, Ho, s, Wo, Cpi, Cp, has_downsample, budget=capacity // 3)
    Jo = Ho // TR

    # ---- layout plumbing (host side): lane-pad channels, phase-split rows and
    #      columns by the stride, and blockify the row axis with a duplicated
    #      1-row halo so every in-kernel access is a static contiguous slice.
    x_cp = x if Cpi == Cin else (
        jnp.zeros((N, H, W, Cpi), jnp.float32).at[..., :Cin].set(x))
    Hfull = s * (Ho + 2)
    x_full = jnp.zeros((N, Hfull, W, Cpi), jnp.float32).at[:, s:s + H].set(x_cp)
    x_pp = (x_full.reshape(N, Ho + 2, s, Wo, s, Cpi)
                  .transpose(0, 2, 4, 1, 3, 5)
                  .reshape(N, s * s, Ho + 2, Wo, Cpi))
    x_blk = jnp.stack([x_pp[:, :, j * TR:j * TR + TR + 2] for j in range(Jo)], axis=1)
    x_blk = x_blk.reshape(N, Jo, s * s * (TR + 2), Wo, Cpi)

    mmr = _mm_ranges(s, TR)
    top_zero = _oob_rows(s, H, TR, 0, mmr)
    bot_zero = _oob_rows(s, H, TR, Jo - 1, mmr) if Jo > 1 else []

    kernel = _make_kernel(s=s, Wo=Wo, TR=TR, Jo=Jo, has_downsample=has_downsample,
                          mm_ranges=mmr, top_zero=top_zero, bot_zero=bot_zero)

    const2 = lambda n, j: (0, 0)
    in_specs = [
        pl.BlockSpec((1, 1, s * s * (TR + 2), Wo, Cpi), lambda n, j: (n, j, 0, 0, 0)),
        pl.BlockSpec((Cpi, Cp), const2),                          # w1 * bn1 scale (bf16)
        pl.BlockSpec((1, Cp), const2),                            # bn1 bias
        pl.BlockSpec((3, 3, Cp, Cp), lambda n, j: (0, 0, 0, 0)),  # w2 * bn2 scale (bf16)
        pl.BlockSpec((1, Cp), const2),                            # bn2 bias
        pl.BlockSpec((Cp, Cp), const2),                           # w3 * bn3 scale (bf16)
        pl.BlockSpec((1, Cp), const2),                            # bn3 bias
    ]
    args = [x_blk, fp["w1"], fp["b1"], fp["w2"], fp["b2"], fp["w3"], fp["b3"]]
    if has_downsample:
        in_specs += [pl.BlockSpec((Cpi, Cp), const2),             # downsample weight
                     pl.BlockSpec((1, Cp), const2)]               # downsample bias
        args += [fp["wd"], fp["bd"]]

    est = _vmem_estimate_bytes(s, TR, Wo, Cpi, Cp, has_downsample)
    cp_kwargs = dict(dimension_semantics=("parallel", "parallel"))
    if est > 16 * 1024 * 1024:
        cp_kwargs["vmem_limit_bytes"] = int(min(est * 5 // 4 + (4 << 20),
                                                capacity * 4 // 5))

    out = pl.pallas_call(
        kernel,
        out_shape=jax.ShapeDtypeStruct((N, Ho, Wo, Cp), jnp.float32),
        grid=(N, Jo),
        in_specs=in_specs,
        out_specs=pl.BlockSpec((1, TR, Wo, Cp), lambda n, j: (n, j, 0, 0)),
        scratch_shapes=[pltpu.VMEM((s * s, TR + 2, Wo + 2, Cp), jnp.float32)],
        compiler_params=pltpu.CompilerParams(**cp_kwargs),
    )(*args)

    out = out[..., :Cout]                       # drop the zero-padded lanes
    return jnp.transpose(out, (0, 3, 1, 2))     # -> NCHW


# ----------------------------------------------------------------------------
# Pure-JAX reference (for correctness check)
# ----------------------------------------------------------------------------
def residual_block_ref(x_nchw, params, *, stride):
    x = jnp.transpose(x_nchw, (0, 2, 3, 1)).astype(jnp.float32)
    Cin = x.shape[-1]
    Cout = params["w1"].shape[1]

    y = jnp.einsum("nhwc,cd->nhwd", x, params["w1"]) * params["s1"] + params["b1"]
    y = jnp.maximum(y, 0.0)
    y = jax.lax.conv_general_dilated(
        y, params["w2"], window_strides=(stride, stride),
        padding=((1, 1), (1, 1)), dimension_numbers=("NHWC", "HWIO", "NHWC"))
    y = y * params["s2"] + params["b2"]
    y = jnp.einsum("nhwc,cd->nhwd", y, params["w3"]) * params["s3"] + params["b3"]

    if stride != 1 or Cin != Cout:
        ident = x[:, ::stride, ::stride, :]
        ident = (jnp.einsum("nhwc,cd->nhwd", ident, params["wd"]) * params["sd"]
                 + params["bd"])
    else:
        ident = x
    out = jnp.maximum(y + ident, 0.0)
    return jnp.transpose(out, (0, 3, 1, 2))


# ----------------------------------------------------------------------------
# Parameter init (deterministic, synthetic -- no checkpoint loading)
# ----------------------------------------------------------------------------
def make_bn_params(key, c, eps=1e-5):
    k1, k2, k3, k4 = jax.random.split(key, 4)
    gamma = 1.0 + 0.1 * jax.random.normal(k1, (c,), jnp.float32)
    beta = 0.1 * jax.random.normal(k2, (c,), jnp.float32)
    mean = 0.1 * jax.random.normal(k3, (c,), jnp.float32)
    var = jax.random.uniform(k4, (c,), jnp.float32, 0.5, 1.5)
    scale = gamma / jnp.sqrt(var + eps)
    bias = beta - mean * scale
    return scale, bias


def make_params(key, cin, cout):
    ks = jax.random.split(key, 8)
    p = {}
    p["w1"] = 0.1 * jax.random.normal(ks[0], (cin, cout), jnp.float32)
    p["s1"], p["b1"] = make_bn_params(ks[1], cout)
    p["w2"] = 0.1 * jax.random.normal(ks[2], (3, 3, cout, cout), jnp.float32)  # HWIO
    p["s2"], p["b2"] = make_bn_params(ks[3], cout)
    p["w3"] = 0.1 * jax.random.normal(ks[4], (cout, cout), jnp.float32)
    p["s3"], p["b3"] = make_bn_params(ks[5], cout)
    p["wd"] = 0.1 * jax.random.normal(ks[6], (cin, cout), jnp.float32)
    p["sd"], p["bd"] = make_bn_params(ks[7], cout)
    return p


# ----------------------------------------------------------------------------
if __name__ == "__main__":
    key = jax.random.PRNGKey(0)
    cases = [
        dict(N=2, cin=8, cout=16, H=16, W=16, stride=2),   # downsample branch active
        dict(N=2, cin=16, cout=16, H=16, W=16, stride=1),  # pure identity shortcut
        dict(N=1, cin=8, cout=16, H=15, W=16, stride=2),   # odd H (bottom halo path)
    ]
    for i, c in enumerate(cases):
        kx, kp, key = jax.random.split(key, 3)
        x = jax.random.normal(kx, (c["N"], c["cin"], c["H"], c["W"]), jnp.float32)
        p = make_params(kp, c["cin"], c["cout"])
        out = jax.block_until_ready(residual_block(x, p, stride=c["stride"]))
        ref = jax.block_until_ready(residual_block_ref(x, p, stride=c["stride"]))
        Ho = (c["H"] - 1) // c["stride"] + 1
        Wo = c["W"] // c["stride"]
        assert out.shape == (c["N"], c["cout"], Ho, Wo), out.shape
        err = float(jnp.max(jnp.abs(out - ref)))
        # bf16 MXU operands with f32 accumulation: allow a bf16-level tolerance.
        assert err < 5e-2, f"case {i}: max abs error too large: {err}"
    print("KERNEL_OK")
</pallas_src>

<mosaic_0001>
module attributes {stable_mosaic.version = 11 : i64} {
  func.func @kernel(%arg0: i32, %arg1: i32, %arg2: memref<1x1x40x8x128xf32, #tpu.memory_space<vmem>>, %arg3: memref<128x128xbf16, #tpu.memory_space<vmem>>, %arg4: memref<1x128xf32, #tpu.memory_space<vmem>>, %arg5: memref<3x3x128x128xbf16, #tpu.memory_space<vmem>>, %arg6: memref<1x128xf32, #tpu.memory_space<vmem>>, %arg7: memref<128x128xbf16, #tpu.memory_space<vmem>>, %arg8: memref<1x128xf32, #tpu.memory_space<vmem>>, %arg9: memref<128x128xbf16, #tpu.memory_space<vmem>>, %arg10: memref<1x128xf32, #tpu.memory_space<vmem>>, %arg11: memref<1x8x8x128xf32, #tpu.memory_space<vmem>>, %arg12: memref<4x10x10x128xf32, #tpu.memory_space<vmem>>) attributes {dimension_semantics = [#tpu.dimension_semantics<parallel>, #tpu.dimension_semantics<parallel>], iteration_bounds = array<i64: 2, 1>, scalar_prefetch = 0 : i64, scratch_operands = 1 : i64, tpu.core_type = #tpu.core_type<tc>, window_params = [{transform_indices = @transform_0, window_bounds = array<i64: 1, 1, 40, 8, 128>}, {pipeline_mode = #tpu.pipeline_mode<synchronous>, transform_indices = @transform_1, window_bounds = array<i64: 128, 128>}, {pipeline_mode = #tpu.pipeline_mode<synchronous>, transform_indices = @transform_2, window_bounds = array<i64: 1, 128>}, {pipeline_mode = #tpu.pipeline_mode<synchronous>, transform_indices = @transform_3, window_bounds = array<i64: 3, 3, 128, 128>}, {pipeline_mode = #tpu.pipeline_mode<synchronous>, transform_indices = @transform_4, window_bounds = array<i64: 1, 128>}, {pipeline_mode = #tpu.pipeline_mode<synchronous>, transform_indices = @transform_5, window_bounds = array<i64: 128, 128>}, {pipeline_mode = #tpu.pipeline_mode<synchronous>, transform_indices = @transform_6, window_bounds = array<i64: 1, 128>}, {pipeline_mode = #tpu.pipeline_mode<synchronous>, transform_indices = @transform_7, window_bounds = array<i64: 128, 128>}, {pipeline_mode = #tpu.pipeline_mode<synchronous>, transform_indices = @transform_8, window_bounds = array<i64: 1, 128>}, {transform_indices = @transform_9, window_bounds = array<i64: 1, 8, 8, 128>}]} {
    %cst = arith.constant 0.000000e+00 : f32
    %0 = vector.broadcast %cst : f32 to vector<10x1x128xf32>
    %c0 = arith.constant 0 : index
    %c0_0 = arith.constant 0 : index
    %c0_1 = arith.constant 0 : index
    %c0_2 = arith.constant 0 : index
    %1 = vector.load %arg12[%c0, %c0_0, %c0_1, %c0_2] : memref<4x10x10x128xf32, #tpu.memory_space<vmem>>, vector<1x10x1x128xf32>
    %2 = vector.shape_cast %1 : vector<1x10x1x128xf32> to vector<10x1x128xf32>
    %3 = vector.shape_cast %0 : vector<10x1x128xf32> to vector<1x10x1x128xf32>
    tpu.vector_store %arg12[%c0, %c0_0, %c0_1, %c0_2], %3 {strides = array<i32>} : memref<4x10x10x128xf32, #tpu.memory_space<vmem>>, vector<1x10x1x128xf32>,
    %cst_3 = arith.constant 0.000000e+00 : f32
    %4 = vector.broadcast %cst_3 : f32 to vector<10x1x128xf32>
    %c0_4 = arith.constant 0 : index
    %c0_5 = arith.constant 0 : index
    %c9 = arith.constant 9 : index
    %c0_6 = arith.constant 0 : index
    %5 = vector.load %arg12[%c0_4, %c0_5, %c9, %c0_6] : memref<4x10x10x128xf32, #tpu.memory_space<vmem>>, vector<1x10x1x128xf32>
    %6 = vector.shape_cast %5 : vector<1x10x1x128xf32> to vector<10x1x128xf32>
    %7 = vector.shape_cast %4 : vector<10x1x128xf32> to vector<1x10x1x128xf32>
    tpu.vector_store %arg12[%c0_4, %c0_5, %c9, %c0_6], %7 {strides = array<i32>} : memref<4x10x10x128xf32, #tpu.memory_space<vmem>>, vector<1x10x1x128xf32>,
    %cst_7 = arith.constant 0.000000e+00 : f32
    %8 = vector.broadcast %cst_7 : f32 to vector<10x1x128xf32>
    %c1 = arith.constant 1 : index
    %c0_8 = arith.constant 0 : index
    %c0_9 = arith.constant 0 : index
    %c0_10 = arith.constant 0 : index
    %9 = vector.load %arg12[%c1, %c0_8, %c0_9, %c0_10] : memref<4x10x10x128xf32, #tpu.memory_space<vmem>>, vector<1x10x1x128xf32>
    %10 = vector.shape_cast %9 : vector<1x10x1x128xf32> to vector<10x1x128xf32>
    %11 = vector.shape_cast %8 : vector<10x1x128xf32> to vector<1x10x1x128xf32>
    tpu.vector_store %arg12[%c1, %c0_8, %c0_9, %c0_10], %11 {strides = array<i32>} : memref<4x10x10x128xf32, #tpu.memory_space<vmem>>, vector<1x10x1x128xf32>,
    %cst_11 = arith.constant 0.000000e+00 : f32
    %12 = vector.broadcast %cst_11 : f32 to vector<10x1x128xf32>
    %c1_12 = arith.constant 1 : index
    %c0_13 = arith.constant 0 : index
    %c9_14 = arith.constant 9 : index
    %c0_15 = arith.constant 0 : index
    %13 = vector.load %arg12[%c1_12, %c0_13, %c9_14, %c0_15] : memref<4x10x10x128xf32, #tpu.memory_space<vmem>>, vector<1x10x1x128xf32>
    %14 = vector.shape_cast %13 : vector<1x10x1x128xf32> to vector<10x1x128xf32>
    %15 = vector.shape_cast %12 : vector<10x1x128xf32> to vector<1x10x1x128xf32>
    tpu.vector_store %arg12[%c1_12, %c0_13, %c9_14, %c0_15], %15 {strides = array<i32>} : memref<4x10x10x128xf32, #tpu.memory_space<vmem>>, vector<1x10x1x128xf32>,
    %cst_16 = arith.constant 0.000000e+00 : f32
    %16 = vector.broadcast %cst_16 : f32 to vector<10x1x128xf32>
    %c2 = arith.constant 2 : index
    %c0_17 = arith.constant 0 : index
    %c0_18 = arith.constant 0 : index
    %c0_19 = arith.constant 0 : index
    %17 = vector.load %arg12[%c2, %c0_17, %c0_18, %c0_19] : memref<4x10x10x128xf32, #tpu.memory_space<vmem>>, vector<1x10x1x128xf32>
    %18 = vector.shape_cast %17 : vector<1x10x1x128xf32> to vector<10x1x128xf32>
    %19 = vector.shape_cast %16 : vector<10x1x128xf32> to vector<1x10x1x128xf32>
    tpu.vector_store %arg12[%c2, %c0_17, %c0_18, %c0_19], %19 {strides = array<i32>} : memref<4x10x10x128xf32, #tpu.memory_space<vmem>>, vector<1x10x1x128xf32>,
    %cst_20 = arith.constant 0.000000e+00 : f32
    %20 = vector.broadcast %cst_20 : f32 to vector<10x1x128xf32>
    %c2_21 = arith.constant 2 : index
    %c0_22 = arith.constant 0 : index
    %c9_23 = arith.constant 9 : index
    %c0_24 = arith.constant 0 : index
    %21 = vector.load %arg12[%c2_21, %c0_22, %c9_23, %c0_24] : memref<4x10x10x128xf32, #tpu.memory_space<vmem>>, vector<1x10x1x128xf32>
    %22 = vector.shape_cast %21 : vector<1x10x1x128xf32> to vector<10x1x128xf32>
    %23 = vector.shape_cast %20 : vector<10x1x128xf32> to vector<1x10x1x128xf32>
    tpu.vector_store %arg12[%c2_21, %c0_22, %c9_23, %c0_24], %23 {strides = array<i32>} : memref<4x10x10x128xf32, #tpu.memory_space<vmem>>, vector<1x10x1x128xf32>,
    %cst_25 = arith.constant 0.000000e+00 : f32
    %24 = vector.broadcast %cst_25 : f32 to vector<10x1x128xf32>
    %c3 = arith.constant 3 : index
    %c0_26 = arith.constant 0 : index
    %c0_27 = arith.constant 0 : index
    %c0_28 = arith.constant 0 : index
    %25 = vector.load %arg12[%c3, %c0_26, %c0_27, %c0_28] : memref<4x10x10x128xf32, #tpu.memory_space<vmem>>, vector<1x10x1x128xf32>
    %26 = vector.shape_cast %25 : vector<1x10x1x128xf32> to vector<10x1x128xf32>
    %27 = vector.shape_cast %24 : vector<10x1x128xf32> to vector<1x10x1x128xf32>
    tpu.vector_store %arg12[%c3, %c0_26, %c0_27, %c0_28], %27 {strides = array<i32>} : memref<4x10x10x128xf32, #tpu.memory_space<vmem>>, vector<1x10x1x128xf32>,
    %cst_29 = arith.constant 0.000000e+00 : f32
    %28 = vector.broadcast %cst_29 : f32 to vector<10x1x128xf32>
    %c3_30 = arith.constant 3 : index
    %c0_31 = arith.constant 0 : index
    %c9_32 = arith.constant 9 : index
    %c0_33 = arith.constant 0 : index
    %29 = vector.load %arg12[%c3_30, %c0_31, %c9_32, %c0_33] : memref<4x10x10x128xf32, #tpu.memory_space<vmem>>, vector<1x10x1x128xf32>
    %30 = vector.shape_cast %29 : vector<1x10x1x128xf32> to vector<10x1x128xf32>
    %31 = vector.shape_cast %28 : vector<10x1x128xf32> to vector<1x10x1x128xf32>
    tpu.vector_store %arg12[%c3_30, %c0_31, %c9_32, %c0_33], %31 {strides = array<i32>} : memref<4x10x10x128xf32, #tpu.memory_space<vmem>>, vector<1x10x1x128xf32>,
    %c0_34 = arith.constant 0 : index
    %c0_35 = arith.constant 0 : index
    %c1_36 = arith.constant 1 : index
    %c0_37 = arith.constant 0 : index
    %c0_38 = arith.constant 0 : index
    %32 = vector.load %arg2[%c0_34, %c0_35, %c1_36, %c0_37, %c0_38] : memref<1x1x40x8x128xf32, #tpu.memory_space<vmem>>, vector<1x1x8x8x128xf32>
    %33 = vector.shape_cast %32 : vector<1x1x8x8x128xf32> to vector<8x8x128xf32>
    %34 = vector.shape_cast %33 : vector<8x8x128xf32> to vector<64x128xf32>
    %35 = arith.truncf %34 : vector<64x128xf32> to vector<64x128xbf16>
    %c0_39 = arith.constant 0 : index
    %c0_40 = arith.constant 0 : index
    %36 = vector.load %arg3[%c0_39, %c0_40] : memref<128x128xbf16, #tpu.memory_space<vmem>>, vector<128x128xbf16>
    %cst_41 = arith.constant dense<0.000000e+00> : vector<64x128xf32>
    %37 = tpu.matmul %35, %36, %cst_41 {dimension_numbers = #tpu.dot_dimension_numbers<[1], [0], [0], [1], [0, 0, 1, 1], [], []>} : vector<64x128xbf16>, vector<128x128xbf16>, vector<64x128xf32> -> vector<64x128xf32>
    %c0_42 = arith.constant 0 : index
    %c0_43 = arith.constant 0 : index
    %38 = vector.load %arg4[%c0_42, %c0_43] : memref<1x128xf32, #tpu.memory_space<vmem>>, vector<1x128xf32>
    %39 = vector.broadcast %38 : vector<1x128xf32> to vector<64x128xf32>
    %40 = arith.addf %37, %39 : vector<64x128xf32>
    %cst_44 = arith.constant 0.000000e+00 : f32
    %41 = vector.broadcast %cst_44 : f32 to vector<64x128xf32>
    %42 = arith.maximumf %40, %41 : vector<64x128xf32>
    %43 = vector.shape_cast %42 : vector<64x128xf32> to vector<8x8x128xf32>
    %c0_45 = arith.constant 0 : index
    %c1_46 = arith.constant 1 : index
    %c1_47 = arith.constant 1 : index
    %c0_48 = arith.constant 0 : index
    %44 = vector.load %arg12[%c0_45, %c1_46, %c1_47, %c0_48] : memref<4x10x10x128xf32, #tpu.memory_space<vmem>>, vector<1x8x8x128xf32>
    %45 = vector.shape_cast %44 : vector<1x8x8x128xf32> to vector<8x8x128xf32>
    %46 = vector.shape_cast %43 : vector<8x8x128xf32> to vector<1x8x8x128xf32>
    tpu.vector_store %arg12[%c0_45, %c1_46, %c1_47, %c0_48], %46 {strides = array<i32>} : memref<4x10x10x128xf32, #tpu.memory_space<vmem>>, vector<1x8x8x128xf32>,
    %c0_49 = arith.constant 0 : index
    %c0_50 = arith.constant 0 : index
    %c11 = arith.constant 11 : index
    %c0_51 = arith.constant 0 : index
    %c0_52 = arith.constant 0 : index
    %47 = vector.load %arg2[%c0_49, %c0_50, %c11, %c0_51, %c0_52] : memref<1x1x40x8x128xf32, #tpu.memory_space<vmem>>, vector<1x1x8x8x128xf32>
    %48 = vector.shape_cast %47 : vector<1x1x8x8x128xf32> to vector<8x8x128xf32>
    %49 = vector.shape_cast %48 : vector<8x8x128xf32> to vector<64x128xf32>
    %50 = arith.truncf %49 : vector<64x128xf32> to vector<64x128xbf16>
    %c0_53 = arith.constant 0 : index
    %c0_54 = arith.constant 0 : index
    %51 = vector.load %arg3[%c0_53, %c0_54] : memref<128x128xbf16, #tpu.memory_space<vmem>>, vector<128x128xbf16>
    %cst_55 = arith.constant dense<0.000000e+00> : vector<64x128xf32>
    %52 = tpu.matmul %50, %51, %cst_55 {dimension_numbers = #tpu.dot_dimension_numbers<[1], [0], [0], [1], [0, 0, 1, 1], [], []>} : vector<64x128xbf16>, vector<128x128xbf16>, vector<64x128xf32> -> vector<64x128xf32>
    %c0_56 = arith.constant 0 : index
    %c0_57 = arith.constant 0 : index
    %53 = vector.load %arg4[%c0_56, %c0_57] : memref<1x128xf32, #tpu.memory_space<vmem>>, vector<1x128xf32>
    %54 = vector.broadcast %53 : vector<1x128xf32> to vector<64x128xf32>
    %55 = arith.addf %52, %54 : vector<64x128xf32>
    %cst_58 = arith.constant 0.000000e+00 : f32
    %56 = vector.broadcast %cst_58 : f32 to vector<64x128xf32>
    %57 = arith.maximumf %55, %56 : vector<64x128xf32>
    %58 = vector.shape_cast %57 : vector<64x128xf32> to vector<8x8x128xf32>
    %c1_59 = arith.constant 1 : index
    %c1_60 = arith.constant 1 : index
    %c1_61 = arith.constant 1 : index
    %c0_62 = arith.constant 0 : index
    %59 = vector.load %arg12[%c1_59, %c1_60, %c1_61, %c0_62] : memref<4x10x10x128xf32, #tpu.memory_space<vmem>>, vector<1x8x8x128xf32>
    %60 = vector.shape_cast %59 : vector<1x8x8x128xf32> to vector<8x8x128xf32>
    %61 = vector.shape_cast %58 : vector<8x8x128xf32> to vector<1x8x8x128xf32>
    tpu.vector_store %arg12[%c1_59, %c1_60, %c1_61, %c0_62], %61 {strides = array<i32>} : memref<4x10x10x128xf32, #tpu.memory_space<vmem>>, vector<1x8x8x128xf32>,
    %c0_63 = arith.constant 0 : index
    %c0_64 = arith.constant 0 : index
    %c20 = arith.constant 20 : index
    %c0_65 = arith.constant 0 : index
    %c0_66 = arith.constant 0 : index
    %62 = vector.load %arg2[%c0_63, %c0_64, %c20, %c0_65, %c0_66] : memref<1x1x40x8x128xf32, #tpu.memory_space<vmem>>, vector<1x1x9x8x128xf32>
    %63 = vector.shape_cast %62 : vector<1x1x9x8x128xf32> to vector<9x8x128xf32>
    %64 = vector.shape_cast %63 : vector<9x8x128xf32> to vector<72x128xf32>
    %65 = arith.truncf %64 : vector<72x128xf32> to vector<72x128xbf16>
    %c0_67 = arith.constant 0 : index
    %c0_68 = arith.constant 0 : index
    %66 = vector.load %arg3[%c0_67, %c0_68] : memref<128x128xbf16, #tpu.memory_space<vmem>>, vector<128x128xbf16>
    %cst_69 = arith.constant dense<0.000000e+00> : vector<72x128xf32>
    %67 = tpu.matmul %65, %66, %cst_69 {dimension_numbers = #tpu.dot_dimension_numbers<[1], [0], [0], [1], [0, 0, 1, 1], [], []>} : vector<72x128xbf16>, vector<128x128xbf16>, vector<72x128xf32> -> vector<72x128xf32>
    %c0_70 = arith.constant 0 : index
    %c0_71 = arith.constant 0 : index
    %68 = vector.load %arg4[%c0_70, %c0_71] : memref<1x128xf32, #tpu.memory_space<vmem>>, vector<1x128xf32>
    %69 = vector.broadcast %68 : vector<1x128xf32> to vector<72x128xf32>
    %70 = arith.addf %67, %69 : vector<72x128xf32>
    %cst_72 = arith.constant 0.000000e+00 : f32
    %71 = vector.broadcast %cst_72 : f32 to vector<72x128xf32>
    %72 = arith.maximumf %70, %71 : vector<72x128xf32>
    %73 = vector.shape_cast %72 : vector<72x128xf32> to vector<9x8x128xf32>
    %c2_73 = arith.constant 2 : index
    %c0_74 = arith.constant 0 : index
    %c1_75 = arith.constant 1 : index
    %c0_76 = arith.constant 0 : index
    %74 = vector.load %arg12[%c2_73, %c0_74, %c1_75, %c0_76] : memref<4x10x10x128xf32, #tpu.memory_space<vmem>>, vector<1x9x8x128xf32>
    %75 = vector.shape_cast %74 : vector<1x9x8x128xf32> to vector<9x8x128xf32>
    %76 = vector.shape_cast %73 : vector<9x8x128xf32> to vector<1x9x8x128xf32>
    tpu.vector_store %arg12[%c2_73, %c0_74, %c1_75, %c0_76], %76 {strides = array<i32>} : memref<4x10x10x128xf32, #tpu.memory_space<vmem>>, vector<1x9x8x128xf32>,
    %c0_77 = arith.constant 0 : index
    %c0_78 = arith.constant 0 : index
    %c30 = arith.constant 30 : index
    %c0_79 = arith.constant 0 : index
    %c0_80 = arith.constant 0 : index
    %77 = vector.load %arg2[%c0_77, %c0_78, %c30, %c0_79, %c0_80] : memref<1x1x40x8x128xf32, #tpu.memory_space<vmem>>, vector<1x1x9x8x128xf32>
    %78 = vector.shape_cast %77 : vector<1x1x9x8x128xf32> to vector<9x8x128xf32>
    %79 = vector.shape_cast %78 : vector<9x8x128xf32> to vector<72x128xf32>
    %80 = arith.truncf %79 : vector<72x128xf32> to vector<72x128xbf16>
    %c0_81 = arith.constant 0 : index
    %c0_82 = arith.constant 0 : index
    %81 = vector.load %arg3[%c0_81, %c0_82] : memref<128x128xbf16, #tpu.memory_space<vmem>>, vector<128x128xbf16>
    %cst_83 = arith.constant dense<0.000000e+00> : vector<72x128xf32>
    %82 = tpu.matmul %80, %81, %cst_83 {dimension_numbers = #tpu.dot_dimension_numbers<[1], [0], [0], [1], [0, 0, 1, 1], [], []>} : vector<72x128xbf16>, vector<128x128xbf16>, vector<72x128xf32> -> vector<72x128xf32>
    %c0_84 = arith.constant 0 : index
    %c0_85 = arith.constant 0 : index
    %83 = vector.load %arg4[%c0_84, %c0_85] : memref<1x128xf32, #tpu.memory_space<vmem>>, vector<1x128xf32>
    %84 = vector.broadcast %83 : vector<1x128xf32> to vector<72x128xf32>
    %85 = arith.addf %82, %84 : vector<72x128xf32>
    %cst_86 = arith.constant 0.000000e+00 : f32
    %86 = vector.broadcast %cst_86 : f32 to vector<72x128xf32>
    %87 = arith.maximumf %85, %86 : vector<72x128xf32>
    %88 = vector.shape_cast %87 : vector<72x128xf32> to vector<9x8x128xf32>
    %c3_87 = arith.constant 3 : index
    %c0_88 = arith.constant 0 : index
    %c1_89 = arith.constant 1 : index
    %c0_90 = arith.constant 0 : index
    %89 = vector.load %arg12[%c3_87, %c0_88, %c1_89, %c0_90] : memref<4x10x10x128xf32, #tpu.memory_space<vmem>>, vector<1x9x8x128xf32>
    %90 = vector.shape_cast %89 : vector<1x9x8x128xf32> to vector<9x8x128xf32>
    %91 = vector.shape_cast %88 : vector<9x8x128xf32> to vector<1x9x8x128xf32>
    tpu.vector_store %arg12[%c3_87, %c0_88, %c1_89, %c0_90], %91 {strides = array<i32>} : memref<4x10x10x128xf32, #tpu.memory_space<vmem>>, vector<1x9x8x128xf32>,
    %c0_i32 = arith.constant 0 : i32
    %92 = arith.cmpi eq, %arg1, %c0_i32 : i32
    %93 = arith.extui %92 : i1 to i32
    %c0_i32_91 = arith.constant 0 : i32
    %94 = arith.cmpi ne, %93, %c0_i32_91 : i32
    scf.if %94 {
      %cst_195 = arith.constant 0.000000e+00 : f32
      %189 = vector.broadcast %cst_195 : f32 to vector<10x128xf32>
      %c2_196 = arith.constant 2 : index
      %c0_197 = arith.constant 0 : index
      %c0_198 = arith.constant 0 : index
      %c0_199 = arith.constant 0 : index
      %190 = vector.load %arg12[%c2_196, %c0_197, %c0_198, %c0_199] : memref<4x10x10x128xf32, #tpu.memory_space<vmem>>, vector<1x1x10x128xf32>
      %191 = vector.shape_cast %190 : vector<1x1x10x128xf32> to vector<10x128xf32>
      %192 = vector.shape_cast %189 : vector<10x128xf32> to vector<1x1x10x128xf32>
      tpu.vector_store %arg12[%c2_196, %c0_197, %c0_198, %c0_199], %192 {strides = array<i32>} : memref<4x10x10x128xf32, #tpu.memory_space<vmem>>, vector<1x1x10x128xf32>,
      %cst_200 = arith.constant 0.000000e+00 : f32
      %193 = vector.broadcast %cst_200 : f32 to vector<10x128xf32>
      %c3_201 = arith.constant 3 : index
      %c0_202 = arith.constant 0 : index
      %c0_203 = arith.constant 0 : index
      %c0_204 = arith.constant 0 : index
      %194 = vector.load %arg12[%c3_201, %c0_202, %c0_203, %c0_204] : memref<4x10x10x128xf32, #tpu.memory_space<vmem>>, vector<1x1x10x128xf32>
      %195 = vector.shape_cast %194 : vector<1x1x10x128xf32> to vector<10x128xf32>
      %196 = vector.shape_cast %193 : vector<10x128xf32> to vector<1x1x10x128xf32>
      tpu.vector_store %arg12[%c3_201, %c0_202, %c0_203, %c0_204], %196 {strides = array<i32>} : memref<4x10x10x128xf32, #tpu.memory_space<vmem>>, vector<1x1x10x128xf32>,
    } else {
    }
    %c3_92 = arith.constant 3 : index
    %c0_93 = arith.constant 0 : index
    %c0_94 = arith.constant 0 : index
    %c0_95 = arith.constant 0 : index
    %95 = vector.load %arg12[%c3_92, %c0_93, %c0_94, %c0_95] : memref<4x10x10x128xf32, #tpu.memory_space<vmem>>, vector<1x8x8x128xf32>
    %96 = vector.shape_cast %95 : vector<1x8x8x128xf32> to vector<8x8x128xf32>
    %97 = vector.shape_cast %96 : vector<8x8x128xf32> to vector<64x128xf32>
    %98 = arith.truncf %97 : vector<64x128xf32> to vector<64x128xbf16>
    %c0_96 = arith.constant 0 : index
    %c0_97 = arith.constant 0 : index
    %c0_98 = arith.constant 0 : index
    %c0_99 = arith.constant 0 : index
    %99 = vector.load %arg5[%c0_96, %c0_97, %c0_98, %c0_99] : memref<3x3x128x128xbf16, #tpu.memory_space<vmem>>, vector<1x1x128x128xbf16>
    %100 = vector.shape_cast %99 : vector<1x1x128x128xbf16> to vector<128x128xbf16>
    %cst_100 = arith.constant dense<0.000000e+00> : vector<64x128xf32>
    %101 = tpu.matmul %98, %100, %cst_100 {dimension_numbers = #tpu.dot_dimension_numbers<[1], [0], [0], [1], [0, 0, 1, 1], [], []>} : vector<64x128xbf16>, vector<128x128xbf16>, vector<64x128xf32> -> vector<64x128xf32>
    %c2_101 = arith.constant 2 : index
    %c0_102 = arith.constant 0 : index
    %c1_103 = arith.constant 1 : index
    %c0_104 = arith.constant 0 : index
    %102 = vector.load %arg12[%c2_101, %c0_102, %c1_103, %c0_104] : memref<4x10x10x128xf32, #tpu.memory_space<vmem>>, vector<1x8x8x128xf32>
    %103 = vector.shape_cast %102 : vector<1x8x8x128xf32> to vector<8x8x128xf32>
    %104 = vector.shape_cast %103 : vector<8x8x128xf32> to vector<64x128xf32>
    %105 = arith.truncf %104 : vector<64x128xf32> to vector<64x128xbf16>
    %c0_105 = arith.constant 0 : index
    %c1_106 = arith.constant 1 : index
    %c0_107 = arith.constant 0 : index
    %c0_108 = arith.constant 0 : index
    %106 = vector.load %arg5[%c0_105, %c1_106, %c0_107, %c0_108] : memref<3x3x128x128xbf16, #tpu.memory_space<vmem>>, vector<1x1x128x128xbf16>
    %107 = vector.shape_cast %106 : vector<1x1x128x128xbf16> to vector<128x128xbf16>
    %cst_109 = arith.constant dense<0.000000e+00> : vector<64x128xf32>
    %108 = tpu.matmul %105, %107, %cst_109 {dimension_numbers = #tpu.dot_dimension_numbers<[1], [0], [0], [1], [0, 0, 1, 1], [], []>} : vector<64x128xbf16>, vector<128x128xbf16>, vector<64x128xf32> -> vector<64x128xf32>
    %109 = arith.addf %101, %108 : vector<64x128xf32>
    %c3_110 = arith.constant 3 : index
    %c0_111 = arith.constant 0 : index
    %c1_112 = arith.constant 1 : index
    %c0_113 = arith.constant 0 : index
    %110 = vector.load %arg12[%c3_110, %c0_111, %c1_112, %c0_113] : memref<4x10x10x128xf32, #tpu.memory_space<vmem>>, vector<1x8x8x128xf32>
    %111 = vector.shape_cast %110 : vector<1x8x8x128xf32> to vector<8x8x128xf32>
    %112 = vector.shape_cast %111 : vector<8x8x128xf32> to vector<64x128xf32>
    %113 = arith.truncf %112 : vector<64x128xf32> to vector<64x128xbf16>
    %c0_114 = arith.constant 0 : index
    %c2_115 = arith.constant 2 : index
    %c0_116 = arith.constant 0 : index
    %c0_117 = arith.constant 0 : index
    %114 = vector.load %arg5[%c0_114, %c2_115, %c0_116, %c0_117] : memref<3x3x128x128xbf16, #tpu.memory_space<vmem>>, vector<1x1x128x128xbf16>
    %115 = vector.shape_cast %114 : vector<1x1x128x128xbf16> to vector<128x128xbf16>
    %cst_118 = arith.constant dense<0.000000e+00> : vector<64x128xf32>
    %116 = tpu.matmul %113, %115, %cst_118 {dimension_numbers = #tpu.dot_dimension_numbers<[1], [0], [0], [1], [0, 0, 1, 1], [], []>} : vector<64x128xbf16>, vector<128x128xbf16>, vector<64x128xf32> -> vector<64x128xf32>
    %117 = arith.addf %109, %116 : vector<64x128xf32>
    %c1_119 = arith.constant 1 : index
    %c1_120 = arith.constant 1 : index
    %c0_121 = arith.constant 0 : index
    %c0_122 = arith.constant 0 : index
    %118 = vector.load %arg12[%c1_119, %c1_120, %c0_121, %c0_122] : memref<4x10x10x128xf32, #tpu.memory_space<vmem>>, vector<1x8x8x128xf32>
    %119 = vector.shape_cast %118 : vector<1x8x8x128xf32> to vector<8x8x128xf32>
    %120 = vector.shape_cast %119 : vector<8x8x128xf32> to vector<64x128xf32>
    %121 = arith.truncf %120 : vector<64x128xf32> to vector<64x128xbf16>
    %c1_123 = arith.constant 1 : index
    %c0_124 = arith.constant 0 : index
    %c0_125 = arith.constant 0 : index
    %c0_126 = arith.constant 0 : index
    %122 = vector.load %arg5[%c1_123, %c0_124, %c0_125, %c0_126] : memref<3x3x128x128xbf16, #tpu.memory_space<vmem>>, vector<1x1x128x128xbf16>
    %123 = vector.shape_cast %122 : vector<1x1x128x128xbf16> to vector<128x128xbf16>
    %cst_127 = arith.constant dense<0.000000e+00> : vector<64x128xf32>
    %124 = tpu.matmul %121, %123, %cst_127 {dimension_numbers = #tpu.dot_dimension_numbers<[1], [0], [0], [1], [0, 0, 1, 1], [], []>} : vector<64x128xbf16>, vector<128x128xbf16>, vector<64x128xf32> -> vector<64x128xf32>
    %125 = arith.addf %117, %124 : vector<64x128xf32>
    %c0_128 = arith.constant 0 : index
    %c1_129 = arith.constant 1 : index
    %c1_130 = arith.constant 1 : index
    %c0_131 = arith.constant 0 : index
    %126 = vector.load %arg12[%c0_128, %c1_129, %c1_130, %c0_131] : memref<4x10x10x128xf32, #tpu.memory_space<vmem>>, vector<1x8x8x128xf32>
    %127 = vector.shape_cast %126 : vector<1x8x8x128xf32> to vector<8x8x128xf32>
    %128 = vector.shape_cast %127 : vector<8x8x128xf32> to vector<64x128xf32>
    %129 = arith.truncf %128 : vector<64x128xf32> to vector<64x128xbf16>
    %c1_132 = arith.constant 1 : index
    %c1_133 = arith.constant 1 : index
    %c0_134 = arith.constant 0 : index
    %c0_135 = arith.constant 0 : index
    %130 = vector.load %arg5[%c1_132, %c1_133, %c0_134, %c0_135] : memref<3x3x128x128xbf16, #tpu.memory_space<vmem>>, vector<1x1x128x128xbf16>
    %131 = vector.shape_cast %130 : vector<1x1x128x128xbf16> to vector<128x128xbf16>
    %cst_136 = arith.constant dense<0.000000e+00> : vector<64x128xf32>
    %132 = tpu.matmul %129, %131, %cst_136 {dimension_numbers = #tpu.dot_dimension_numbers<[1], [0], [0], [1], [0, 0, 1, 1], [], []>} : vector<64x128xbf16>, vector<128x128xbf16>, vector<64x128xf32> -> vector<64x128xf32>
    %133 = arith.addf %125, %132 : vector<64x128xf32>
    %c1_137 = arith.constant 1 : index
    %c1_138 = arith.constant 1 : index
    %c1_139 = arith.constant 1 : index
    %c0_140 = arith.constant 0 : index
    %134 = vector.load %arg12[%c1_137, %c1_138, %c1_139, %c0_140] : memref<4x10x10x128xf32, #tpu.memory_space<vmem>>, vector<1x8x8x128xf32>
    %135 = vector.shape_cast %134 : vector<1x8x8x128xf32> to vector<8x8x128xf32>
    %136 = vector.shape_cast %135 : vector<8x8x128xf32> to vector<64x128xf32>
    %137 = arith.truncf %136 : vector<64x128xf32> to vector<64x128xbf16>
    %c1_141 = arith.constant 1 : index
    %c2_142 = arith.constant 2 : index
    %c0_143 = arith.constant 0 : index
    %c0_144 = arith.constant 0 : index
    %138 = vector.load %arg5[%c1_141, %c2_142, %c0_143, %c0_144] : memref<3x3x128x128xbf16, #tpu.memory_space<vmem>>, vector<1x1x128x128xbf16>
    %139 = vector.shape_cast %138 : vector<1x1x128x128xbf16> to vector<128x128xbf16>
    %cst_145 = arith.constant dense<0.000000e+00> : vector<64x128xf32>
    %140 = tpu.matmul %137, %139, %cst_145 {dimension_numbers = #tpu.dot_dimension_numbers<[1], [0], [0], [1], [0, 0, 1, 1], [], []>} : vector<64x128xbf16>, vector<128x128xbf16>, vector<64x128xf32> -> vector<64x128xf32>
    %141 = arith.addf %133, %140 : vector<64x128xf32>
    %c3_146 = arith.constant 3 : index
    %c1_147 = arith.constant 1 : index
    %c0_148 = arith.constant 0 : index
    %c0_149 = arith.constant 0 : index
    %142 = vector.load %arg12[%c3_146, %c1_147, %c0_148, %c0_149] : memref<4x10x10x128xf32, #tpu.memory_space<vmem>>, vector<1x8x8x128xf32>
    %143 = vector.shape_cast %142 : vector<1x8x8x128xf32> to vector<8x8x128xf32>
    %144 = vector.shape_cast %143 : vector<8x8x128xf32> to vector<64x128xf32>
    %145 = arith.truncf %144 : vector<64x128xf32> to vector<64x128xbf16>
    %c2_150 = arith.constant 2 : index
    %c0_151 = arith.constant 0 : index
    %c0_152 = arith.constant 0 : index
    %c0_153 = arith.constant 0 : index
    %146 = vector.load %arg5[%c2_150, %c0_151, %c0_152, %c0_153] : memref<3x3x128x128xbf16, #tpu.memory_space<vmem>>, vector<1x1x128x128xbf16>
    %147 = vector.shape_cast %146 : vector<1x1x128x128xbf16> to vector<128x128xbf16>
    %cst_154 = arith.constant dense<0.000000e+00> : vector<64x128xf32>
    %148 = tpu.matmul %145, %147, %cst_154 {dimension_numbers = #tpu.dot_dimension_numbers<[1], [0], [0], [1], [0, 0, 1, 1], [], []>} : vector<64x128xbf16>, vector<128x128xbf16>, vector<64x128xf32> -> vector<64x128xf32>
    %149 = arith.addf %141, %148 : vector<64x128xf32>
    %c2_155 = arith.constant 2 : index
    %c1_156 = arith.constant 1 : index
    %c1_157 = arith.constant 1 : index
    %c0_158 = arith.constant 0 : index
    %150 = vector.load %arg12[%c2_155, %c1_156, %c1_157, %c0_158] : memref<4x10x10x128xf32, #tpu.memory_space<vmem>>, vector<1x8x8x128xf32>
    %151 = vector.shape_cast %150 : vector<1x8x8x128xf32> to vector<8x8x128xf32>
    %152 = vector.shape_cast %151 : vector<8x8x128xf32> to vector<64x128xf32>
    %153 = arith.truncf %152 : vector<64x128xf32> to vector<64x128xbf16>
    %c2_159 = arith.constant 2 : index
    %c1_160 = arith.constant 1 : index
    %c0_161 = arith.constant 0 : index
    %c0_162 = arith.constant 0 : index
    %154 = vector.load %arg5[%c2_159, %c1_160, %c0_161, %c0_162] : memref<3x3x128x128xbf16, #tpu.memory_space<vmem>>, vector<1x1x128x128xbf16>
    %155 = vector.shape_cast %154 : vector<1x1x128x128xbf16> to vector<128x128xbf16>
    %cst_163 = arith.constant dense<0.000000e+00> : vector<64x128xf32>
    %156 = tpu.matmul %153, %155, %cst_163 {dimension_numbers = #tpu.dot_dimension_numbers<[1], [0], [0], [1], [0, 0, 1, 1], [], []>} : vector<64x128xbf16>, vector<128x128xbf16>, vector<64x128xf32> -> vector<64x128xf32>
    %157 = arith.addf %149, %156 : vector<64x128xf32>
    %c3_164 = arith.constant 3 : index
    %c1_165 = arith.constant 1 : index
    %c1_166 = arith.constant 1 : index
    %c0_167 = arith.constant 0 : index
    %158 = vector.load %arg12[%c3_164, %c1_165, %c1_166, %c0_167] : memref<4x10x10x128xf32, #tpu.memory_space<vmem>>, vector<1x8x8x128xf32>
    %159 = vector.shape_cast %158 : vector<1x8x8x128xf32> to vector<8x8x128xf32>
    %160 = vector.shape_cast %159 : vector<8x8x128xf32> to vector<64x128xf32>
    %161 = arith.truncf %160 : vector<64x128xf32> to vector<64x128xbf16>
    %c2_168 = arith.constant 2 : index
    %c2_169 = arith.constant 2 : index
    %c0_170 = arith.constant 0 : index
    %c0_171 = arith.constant 0 : index
    %162 = vector.load %arg5[%c2_168, %c2_169, %c0_170, %c0_171] : memref<3x3x128x128xbf16, #tpu.memory_space<vmem>>, vector<1x1x128x128xbf16>
    %163 = vector.shape_cast %162 : vector<1x1x128x128xbf16> to vector<128x128xbf16>
    %cst_172 = arith.constant dense<0.000000e+00> : vector<64x128xf32>
    %164 = tpu.matmul %161, %163, %cst_172 {dimension_numbers = #tpu.dot_dimension_numbers<[1], [0], [0], [1], [0, 0, 1, 1], [], []>} : vector<64x128xbf16>, vector<128x128xbf16>, vector<64x128xf32> -> vector<64x128xf32>
    %165 = arith.addf %157, %164 : vector<64x128xf32>
    %c0_173 = arith.constant 0 : index
    %c0_174 = arith.constant 0 : index
    %166 = vector.load %arg6[%c0_173, %c0_174] : memref<1x128xf32, #tpu.memory_space<vmem>>, vector<1x128xf32>
    %167 = vector.broadcast %166 : vector<1x128xf32> to vector<64x128xf32>
    %168 = arith.addf %165, %167 : vector<64x128xf32>
    %169 = arith.truncf %168 : vector<64x128xf32> to vector<64x128xbf16>
    %c0_175 = arith.constant 0 : index
    %c0_176 = arith.constant 0 : index
    %170 = vector.load %arg7[%c0_175, %c0_176] : memref<128x128xbf16, #tpu.memory_space<vmem>>, vector<128x128xbf16>
    %cst_177 = arith.constant dense<0.000000e+00> : vector<64x128xf32>
    %171 = tpu.matmul %169, %170, %cst_177 {dimension_numbers = #tpu.dot_dimension_numbers<[1], [0], [0], [1], [0, 0, 1, 1], [], []>} : vector<64x128xbf16>, vector<128x128xbf16>, vector<64x128xf32> -> vector<64x128xf32>
    %c0_178 = arith.constant 0 : index
    %c0_179 = arith.constant 0 : index
    %172 = vector.load %arg8[%c0_178, %c0_179] : memref<1x128xf32, #tpu.memory_space<vmem>>, vector<1x128xf32>
    %173 = vector.broadcast %172 : vector<1x128xf32> to vector<64x128xf32>
    %174 = arith.addf %171, %173 : vector<64x128xf32>
    %c0_180 = arith.constant 0 : index
    %c0_181 = arith.constant 0 : index
    %c1_182 = arith.constant 1 : index
    %c0_183 = arith.constant 0 : index
    %c0_184 = arith.constant 0 : index
    %175 = vector.load %arg2[%c0_180, %c0_181, %c1_182, %c0_183, %c0_184] : memref<1x1x40x8x128xf32, #tpu.memory_space<vmem>>, vector<1x1x8x8x128xf32>
    %176 = vector.shape_cast %175 : vector<1x1x8x8x128xf32> to vector<8x8x128xf32>
    %177 = vector.shape_cast %176 : vector<8x8x128xf32> to vector<64x128xf32>
    %178 = arith.truncf %177 : vector<64x128xf32> to vector<64x128xbf16>
    %c0_185 = arith.constant 0 : index
    %c0_186 = arith.constant 0 : index
    %179 = vector.load %arg9[%c0_185, %c0_186] : memref<128x128xbf16, #tpu.memory_space<vmem>>, vector<128x128xbf16>
    %cst_187 = arith.constant dense<0.000000e+00> : vector<64x128xf32>
    %180 = tpu.matmul %178, %179, %cst_187 {dimension_numbers = #tpu.dot_dimension_numbers<[1], [0], [0], [1], [0, 0, 1, 1], [], []>} : vector<64x128xbf16>, vector<128x128xbf16>, vector<64x128xf32> -> vector<64x128xf32>
    %c0_188 = arith.constant 0 : index
    %c0_189 = arith.constant 0 : index
    %181 = vector.load %arg10[%c0_188, %c0_189] : memref<1x128xf32, #tpu.memory_space<vmem>>, vector<1x128xf32>
    %182 = vector.broadcast %181 : vector<1x128xf32> to vector<64x128xf32>
    %183 = arith.addf %180, %182 : vector<64x128xf32>
    %184 = arith.addf %174, %183 : vector<64x128xf32>
    %cst_190 = arith.constant 0.000000e+00 : f32
    %185 = vector.broadcast %cst_190 : f32 to vector<64x128xf32>
    %186 = arith.maximumf %184, %185 : vector<64x128xf32>
    %187 = vector.shape_cast %186 : vector<64x128xf32> to vector<1x8x8x128xf32>
    %c0_191 = arith.constant 0 : index
    %c0_192 = arith.constant 0 : index
    %c0_193 = arith.constant 0 : index
    %c0_194 = arith.constant 0 : index
    %188 = vector.load %arg11[%c0_191, %c0_192, %c0_193, %c0_194] : memref<1x8x8x128xf32, #tpu.memory_space<vmem>>, vector<1x8x8x128xf32>
    tpu.vector_store %arg11[%c0_191, %c0_192, %c0_193, %c0_194], %187 {strides = array<i32>} : memref<1x8x8x128xf32, #tpu.memory_space<vmem>>, vector<1x8x8x128xf32>,
    return
  }
  func.func @transform_0(%arg0: i32, %arg1: i32) -> (i32, i32, i32, i32, i32) {
    %c0_i32 = arith.constant 0 : i32
    %c0_i32_0 = arith.constant 0 : i32
    %c0_i32_1 = arith.constant 0 : i32
    %c0_i32_2 = arith.constant 0 : i32
    return %arg0, %arg1, %c0_i32, %c0_i32_0, %c0_i32_1 : i32, i32, i32, i32, i32
  }
  func.func @transform_1(%arg0: i32, %arg1: i32) -> (i32, i32) {
    %c0_i32 = arith.constant 0 : i32
    %c0_i32_0 = arith.constant 0 : i32
    %c0_i32_1 = arith.constant 0 : i32
    return %c0_i32, %c0_i32_0 : i32, i32
  }
  func.func @transform_2(%arg0: i32, %arg1: i32) -> (i32, i32) {
    %c0_i32 = arith.constant 0 : i32
    %c0_i32_0 = arith.constant 0 : i32
    %c0_i32_1 = arith.constant 0 : i32
    return %c0_i32, %c0_i32_0 : i32, i32
  }
  func.func @transform_3(%arg0: i32, %arg1: i32) -> (i32, i32, i32, i32) {
    %c0_i32 = arith.constant 0 : i32
    %c0_i32_0 = arith.constant 0 : i32
    %c0_i32_1 = arith.constant 0 : i32
    %c0_i32_2 = arith.constant 0 : i32
    %c0_i32_3 = arith.constant 0 : i32
    return %c0_i32, %c0_i32_0, %c0_i32_1, %c0_i32_2 : i32, i32, i32, i32
  }
  func.func @transform_4(%arg0: i32, %arg1: i32) -> (i32, i32) {
    %c0_i32 = arith.constant 0 : i32
    %c0_i32_0 = arith.constant 0 : i32
    %c0_i32_1 = arith.constant 0 : i32
    return %c0_i32, %c0_i32_0 : i32, i32
  }
  func.func @transform_5(%arg0: i32, %arg1: i32) -> (i32, i32) {
    %c0_i32 = arith.constant 0 : i32
    %c0_i32_0 = arith.constant 0 : i32
    %c0_i32_1 = arith.constant 0 : i32
    return %c0_i32, %c0_i32_0 : i32, i32
  }
  func.func @transform_6(%arg0: i32, %arg1: i32) -> (i32, i32) {
    %c0_i32 = arith.constant 0 : i32
    %c0_i32_0 = arith.constant 0 : i32
    %c0_i32_1 = arith.constant 0 : i32
    return %c0_i32, %c0_i32_0 : i32, i32
  }
  func.func @transform_7(%arg0: i32, %arg1: i32) -> (i32, i32) {
    %c0_i32 = arith.constant 0 : i32
    %c0_i32_0 = arith.constant 0 : i32
    %c0_i32_1 = arith.constant 0 : i32
    return %c0_i32, %c0_i32_0 : i32, i32
  }
  func.func @transform_8(%arg0: i32, %arg1: i32) -> (i32, i32) {
    %c0_i32 = arith.constant 0 : i32
    %c0_i32_0 = arith.constant 0 : i32
    %c0_i32_1 = arith.constant 0 : i32
    return %c0_i32, %c0_i32_0 : i32, i32
  }
  func.func @transform_9(%arg0: i32, %arg1: i32) -> (i32, i32, i32, i32) {
    %c0_i32 = arith.constant 0 : i32
    %c0_i32_0 = arith.constant 0 : i32
    %c0_i32_1 = arith.constant 0 : i32
    return %arg0, %arg1, %c0_i32, %c0_i32_0 : i32, i32, i32, i32
  }
}

</mosaic_0001>

<bundles_post_ra>
// kernel: tpu_custom_call.1
= control target key start
LH: loop header
LB: loop body
LE: loop exit
PB: predicated region body
PF: predicated region fallthrough
CT: control target
= control target key end

     0   :  { %s4987_s0 = inlined_call_operand.hbm [shape: f32[2,1,40,8,128], index: 0, kind: input, shape index: {}]   ;;  %s4988_s1 = inlined_call_operand.hbm [shape: bf16[128,128], index: 1, kind: input, shape index: {}]   ;;  %s4989_s2 = inlined_call_operand.vmem [shape: f32[1,128], index: 2, kind: input, shape index: {}]   ;;  %s4990_s3 = inlined_call_operand.hbm [shape: bf16[3,3,128,128], index: 3, kind: input, shape index: {}]   ;;  %s4991_s4 = inlined_call_operand.vmem [shape: f32[1,128], index: 4, kind: input, shape index: {}]   ;;  %s4992_s5 = inlined_call_operand.hbm [shape: bf16[128,128], index: 5, kind: input, shape index: {}]   ;;  %s4993_s6 = inlined_call_operand.vmem [shape: f32[1,128], index: 6, kind: input, shape index: {}]   ;;  %s4994_s7 = inlined_call_operand.hbm [shape: bf16[128,128], index: 7, kind: input, shape index: {}]   ;;  %s4995_s8 = inlined_call_operand.vmem [shape: f32[1,128], index: 8, kind: input, shape index: {}]   ;;  %s4996_s9 = inlined_call_operand.hbm [shape: f32[2,8,8,128], index: 9, kind: output, shape index: {}]  }
   0x1   :  { %5004 = sst [smem:[#allocation20_spill]] %s4993_s6 }
   0x2   :  { %5005 = sst [smem:[#allocation21_spill]] %s4995_s8 }
   0x3   :  { %5006 = sst [smem:[#allocation22_spill]] %s4996_s9 }
   0x4   :  { %14 = vsyncpa [#allocation4], 0 }
   0x5   :  { %16 = vsyncpa [#allocation4 + $0x1], 0 }
   0x6   :  { %17 = vsyncpa [#allocation7], 0 }
   0x7   :  { %18 = vsyncpa [#allocation10], 0 }
   0x8   :  { %19 = vsyncpa [#allocation5], 0 }
   0x9   :  { %21 = vsyncpa [#allocation5 + $0x1], 0  ;;  %s4383_s30 = smov 0   ;;  %s4385_s10 = smov 0  }
   0xa   :  { %s4387_s11 = smov 0   ;;  %s4389_s12 = smov 0  }
   0xb   :  { %s4391_s13 = smov 0   ;;  %s4393_s14 = smov 0  }
   0xc LB: > { %5007 = sst [smem:[#allocation17_spill]] %s4297_s30  ;;  %s3007_s15 = sadd.s32 4294967295, %s4317_s14   ;;  %s4317_s14 = sphi %s4393_s14, %s27_s14   ;;  %s4313_s13 = sphi %s4391_s13, %s5036_s13   ;;  %s4309_s12 = sphi %s4389_s12, %s5035_s12   ;;  %s4305_s11 = sphi %s4387_s11, %s5034_s11   ;;  %s4301_s10 = sphi %s4385_s10, %s5033_s10   ;;  %s4297_s30 = sphi %s4383_s30, %s5032_s30  }
   0xd   : > { %5008 = sst [smem:[#allocation18_spill]] %s4309_s12  ;;  %s3008_s16 = sadd.s32 4294967294, %s4317_s14  }
   0xe   : > { %p61_p0 = scmp.ne.s32.totalorder %s4301_s10, %s4297_s30  ;;  %p4417_p1 = scmp.eq.s32.totalorder %s3007_s15, 0 }
   0xf   : > { %p4421_p2 = scmp.eq.s32.totalorder %s3007_s15, 1  ;;  %p261_p3 = scmp.eq.s32.totalorder %s3008_s16, 1 }
  0x10   : > { %s5009_s17 = scalar_select %p4417_p1, 1, 0 }
  0x11   : > { %s5010_s18 = scalar_select %p4421_p2, 1, 0 }
  0x12   : > { %p4427_p4 = por %p4417_p1, %p61_p0  ;;  %p3009_p5 = scmp.ge.s32.totalorder %s4317_s14, 1 }
  0x13   : > { %p4432_p6 = por %p261_p3, %p61_p0  ;;  %p268_p7 = scmp.lt.s32.totalorder %s4317_s14, 3 }
  0x14   : > { %s5011_s19 = scalar_select %p4427_p4, 1, 0 }
  0x15   : > { %s5012_s20 = scalar_select %p4432_p6, 1, 0 }
  0x16   : > { %p4437_p8 = pnand %p3009_p5, %p268_p7  ;;  %s4319_s22 = smov [#allocation6]  }
  0x17   : > { %5013 = sst [smem:[#allocation19_spill]] %s5012_s20  ;;  %s280_s23 = sshll.u32 %s4319_s22, 4  ;;  %s4441_s23 = int_to_ptr.vmem [resolvable:$true] %s280_s23 }
  0x18   : > { %s5014_s21 = scalar_select %p4437_p8, 1, 0 }
  0x19   : > { %p3874_p9 = pneg %p4437_p8  ;;  %s4320_s25 = smov [#allocation9]  }
  0x1a   : > { %s312_s26 = sshll.u32 %s4320_s25, 4  ;;  %s4321_s27 = smov [#allocation8]   ;;  %s4452_s26 = int_to_ptr.vmem [resolvable:$true] %s312_s26 }
  0x1b   : > { %p4448_p11 = pnand %p3874_p9, %p4417_p1  ;;  %s4454_s28 = sshll.u32 %s4321_s27, 4  ;;  %s297_s28 = int_to_ptr.vmem [resolvable:$true] %s4454_s28 }
  0x1c   : > { %s4085_s16 = scalar_lea.hbm %s4988_s1, 1024 }
  0x1d   : > { %p4086_p12 = scmp.ne.s32.totalorder %s4988_s1, %s4085_s16  ;;  %p4464_p13 = pneg %p4448_p11 }
  0x1e   : > { %p4092_p5 = scmp.lt.u32.totalorder %s4085_s16, %s4988_s1 }
  0x1f   : > { %p4088_p0 = pnand %p4464_p13, %p4086_p12 }
  0x21   : > { %p4089_p3 = pneg %p4088_p0 }
  0x23   : > { %p4094_p7 = pnand %p4092_p5, %p4089_p3 }
  0x25   : > { %4097 = shalt.err (!%p4094_p7)
}
  0x26   : > { %s4098_s20 = scalar_lea.vmem %s4441_s23, 1024  ;;  %p4106_p1 = scmp.lt.s32.totalorder %s4441_s23, %s4441_s23 }
  0x27   : > { %p4099_p9 = scmp.ne.s32.totalorder %s4441_s23, %s4098_s20  ;;  %p4107_p4 = scmp.lt.s32.totalorder %s4098_s20, %s4098_s20 }
  0x29   : > { %p4101_p10 = pnand %p4099_p9, %p4464_p13  ;;  %p4108_p12 = por %p4107_p4, %p4106_p1 }
  0x2b   : > { %p4102_p6 = pneg %p4101_p10 }
  0x2d   : > { %p4109_p0 = pnand %p4108_p12, %p4102_p6 }
  0x2f   : > { %4112 = shalt.err (!%p4109_p0)
}
  0x30   : > { %s4322_s29 = smov 64   ;;  %s4323_s15 = smov 4  }
  0x31   : > { %3877 = dma.hbm_to_vmem [thread:$0]  (!%p4448_p11), %s4988_s1, 1024, %s4441_s23, [#allocation7], %s4322_s29, %s4322_s29, %s4323_s15  }
  0x32   : > { %s4113_s20 = scalar_lea.hbm %s4992_s5, 1024 }
  0x33   : > { %p4114_p1 = scmp.ne.s32.totalorder %s4992_s5, %s4113_s20  ;;  %p4120_p10 = scmp.lt.u32.totalorder %s4113_s20, %s4992_s5 }
  0x35   : > { %p4116_p4 = pnand %p4114_p1, %p4464_p13 }
  0x37   : > { %p4117_p6 = pneg %p4116_p4 }
  0x39   : > { %p4122_p3 = pnand %p4120_p10, %p4117_p6 }
  0x3b   : > { %4125 = shalt.err (!%p4122_p3)
}
  0x3c   : > { %s4126_s23 = scalar_lea.vmem %s4452_s26, 1024  ;;  %p4134_p12 = scmp.lt.s32.totalorder %s4452_s26, %s4452_s26 }
  0x3d   : > { %p4127_p5 = scmp.ne.s32.totalorder %s4452_s26, %s4126_s23  ;;  %p4135_p0 = scmp.lt.s32.totalorder %s4126_s23, %s4126_s23 }
  0x3f   : > { %p4129_p7 = pnand %p4127_p5, %p4464_p13  ;;  %p4136_p1 = por %p4135_p0, %p4134_p12 }
  0x41   : > { %p4130_p9 = pneg %p4129_p7 }
  0x43   : > { %p4137_p4 = pnand %p4136_p1, %p4130_p9 }
  0x45   : > { %4140 = shalt.err (!%p4137_p4)
}
  0x46   : > { %3883 = dma.hbm_to_vmem [thread:$0]  (!%p4448_p11), %s4992_s5, 1024, %s4452_s26, [#allocation10], %s4322_s29, %s4322_s29, %s4323_s15  }
  0x47   : > { %s4141_s16 = scalar_lea.hbm %s4990_s3, 9216 }
  0x48   : > { %p4142_p6 = scmp.ne.s32.totalorder %s4990_s3, %s4141_s16  ;;  %p4148_p5 = scmp.lt.u32.totalorder %s4141_s16, %s4990_s3 }
  0x4a   : > { %p4144_p10 = pnand %p4142_p6, %p4464_p13 }
  0x4c   : > { %p4145_p3 = pneg %p4144_p10 }
  0x4e   : > { %p4150_p7 = pnand %p4148_p5, %p4145_p3 }
  0x50   : > { %4153 = shalt.err (!%p4150_p7)
}
  0x51   : > { %s4154_s23 = scalar_lea.vmem %s297_s28, 9216  ;;  %p4162_p1 = scmp.lt.s32.totalorder %s297_s28, %s297_s28 }
  0x52   : > { %p4155_p9 = scmp.ne.s32.totalorder %s297_s28, %s4154_s23  ;;  %p4163_p4 = scmp.lt.s32.totalorder %s4154_s23, %s4154_s23 }
  0x54   : > { %p4157_p12 = pnand %p4155_p9, %p4464_p13  ;;  %p4164_p8 = por %p4163_p4, %p4162_p1 }
  0x56   : > { %p4158_p0 = pneg %p4157_p12 }
  0x58   : > { %p4165_p2 = pnand %p4164_p8, %p4158_p0 }
  0x5a   : > { %4168 = shalt.err (!%p4165_p2)
}
  0x5b   : > { %3880 = dma.hbm_to_vmem [thread:$0]  (!%p4448_p11), %s4990_s3, 9216, %s297_s28, [#allocation7], %s4322_s29, %s4322_s29, %s4323_s15  }
  0x5c   : > { %s4324_s8 = smov [#allocation11]   ;;  %s4169_s22 = scalar_lea.hbm %s4994_s7, 1024 }
  0x5d   : > { %s328_s9 = sshll.u32 %s4324_s8, 4  ;;  %p4170_p2 = scmp.ne.s32.totalorder %s4994_s7, %s4169_s22  ;;  %s329_s9 = int_to_ptr.vmem [resolvable:$true] %s328_s9 }
  0x5e   : > { %p4176_p10 = scmp.lt.u32.totalorder %s4169_s22, %s4994_s7 }
  0x5f   : > { %p4172_p8 = pnand %p4170_p2, %p4464_p13 }
  0x61   : > { %p4173_p6 = pneg %p4172_p8 }
  0x63   : > { %p4178_p3 = pnand %p4176_p10, %p4173_p6 }
  0x65   : > { %4181 = shalt.err (!%p4178_p3)
}
  0x66   : > { %s4182_s28 = scalar_lea.vmem %s329_s9, 1024  ;;  %p4190_p12 = scmp.lt.s32.totalorder %s329_s9, %s329_s9 }
  0x67   : > { %p4183_p5 = scmp.ne.s32.totalorder %s329_s9, %s4182_s28  ;;  %p4191_p0 = scmp.lt.s32.totalorder %s4182_s28, %s4182_s28 }
  0x69   : > { %p4185_p7 = pnand %p4183_p5, %p4464_p13  ;;  %p4192_p1 = por %p4191_p0, %p4190_p12 }
  0x6b   : > { %p4186_p9 = pneg %p4185_p7 }
  0x6d   : > { %p4193_p4 = pnand %p4192_p1, %p4186_p9 }
  0x6f   : > { %4196 = shalt.err (!%p4193_p4)
}
  0x70   : > { %3886 = dma.hbm_to_vmem [thread:$0]  (!%p4448_p11), %s4994_s7, 1024, %s329_s9, [#allocation10], %s4322_s29, %s4322_s29, %s4323_s15  }
  0x71   : > { %s39_s30 = sadd.s32 1, %s4313_s13  ;;  %s48_s24 = sadd.s32 1, %s4305_s11 }
  0x72   : > { %p41_p13 = scmp.ge.s32.totalorder %s39_s30, 2  ;;  %p55_p2 = scmp.ne.s32.totalorder %s4305_s11, %s4301_s10 }
  0x73   : > { %p56_p8 = scmp.eq.s32.totalorder %s4317_s14, 0  ;;  %p3899_p6 = scmp.lt.s32.totalorder %s4317_s14, 2 }
  0x74   : > { %s5038_s30 = smov (%p41_p13, %s39_s30), 0  ;;  %p5017_p3 = scmp.ne.s32.totalorder %s5010_s18, 0 }
  0x75   : > { %p57_p10 = por %p56_p8, %p55_p2  ;;  %s43_s12 = ssub.s32 %s4313_s13, %s5038_s30 }
  0x76   : > { %p4567_p5 = por %p5017_p3, %p55_p2  ;;  %s345_s16 = sand.u32 1, %s4305_s11  }
  0x77   : > { %p46_p7 = scmp.eq.s32.totalorder %s43_s12, 0  ;;  %s3851_s29 = smul.u32 320, %s345_s16 }
  0x78   : > { %p4574_p11 = pnand %p3899_p6, %p57_p10  ;;  %s3852_s22 = smul.u32 5120, %s4313_s13 }
  0x79   : > { %s4579_s9 = scalar_select %p46_p7, %s4305_s11, %s48_s24  }
  0x7a   : > { %s349_s25 = scalar_lea.vmem [#allocation3], %s3851_s29  ;;  %s4585_s23 = scalar_lea.hbm %s4987_s0, %s3852_s22 }
  0x7b   : > { %s358_s27 = sshll.u32 %s349_s25, 4  ;;  %s4589_s28 = scalar_lea.sflag [#allocation4], %s345_s16  ;;  %s4587_s27 = int_to_ptr.vmem [resolvable:$true] %s358_s27 }
  0x7c   : > { %s4197_s26 = scalar_lea.hbm %s4585_s23, 5120  ;;  %p4199_p12 = pneg %p4574_p11 }
  0x7d   : > { %p4198_p9 = scmp.ne.s32.totalorder %s4585_s23, %s4197_s26  ;;  %s4202_s12 = scalar_lea.hbm %s4987_s0, 10240 }
  0x7e   : > { %p4203_p4 = scmp.lt.u32.totalorder %s4585_s23, %s4987_s0  ;;  %p4204_p13 = scmp.lt.u32.totalorder %s4202_s12, %s4197_s26 }
  0x7f   : > { %p4200_p0 = pnand %p4199_p12, %p4198_p9  ;;  %p4206_p8 = scmp.lt.u32.totalorder %s4197_s26, %s4585_s23 }
  0x80   : > { %p4205_p2 = por %p4204_p13, %p4203_p4 }
  0x81   : > { %p4201_p1 = pneg %p4200_p0 }
  0x82   : > { %p4207_p6 = por %p4206_p8, %p4205_p2 }
  0x84   : > { %p4208_p10 = pnand %p4207_p6, %p4201_p1 }
  0x86   : > { %4211 = shalt.err (!%p4208_p10)
}
  0x87   : > { %s4212_s16 = scalar_lea.vmem %s4587_s27, 5120  ;;  %s4325_s25 = smov [#allocation3]  }
  0x88   : > { %p4213_p3 = scmp.ne.s32.totalorder %s4587_s27, %s4212_s16  ;;  %s4217_s18 = sshll.u32 %s4325_s25, 4  ;;  %s4218_s18 = int_to_ptr.vmem [resolvable:$false] %s4217_s18 }
  0x89   : > { %s4219_s20 = scalar_lea.vmem %s4218_s18, 10240  ;;  %p4220_p0 = scmp.lt.s32.totalorder %s4587_s27, %s4218_s18 }
  0x8a   : > { %p4215_p7 = pnand %p4213_p3, %p4199_p12  ;;  %p4221_p4 = scmp.lt.s32.totalorder %s4219_s20, %s4212_s16 }
  0x8c   : > { %p4216_p9 = pneg %p4215_p7  ;;  %p4222_p13 = por %p4221_p4, %p4220_p0 }
  0x8e   : > { %p4223_p2 = pnand %p4222_p13, %p4216_p9 }
  0x90   : > { %4226 = shalt.err (!%p4223_p2)
}
  0x91   : > { %s4326_s26 = smov 128   ;;  %s4327_s6 = smov 8  }
  0x92   : > { %3890 = dma.hbm_to_vmem [thread:$0]  (!%p4574_p11), %s4585_s23, 5120, %s4587_s27, %s4589_s28, %s4326_s26, %s4326_s26, %s4327_s6  }
  0x93   : > { %p5020_p12 = scmp.ne.s32.totalorder %s5014_s21, 0 }
  0x94   : > { %s4620_s24 = sand.u32 (!%p5020_p12), 1, %s4301_s10   ;;  %p5021_p1 = scmp.ne.s32.totalorder (!%p5020_p12), %s5011_s19, 0 }
  0x95   : > { %370 = sbr.rel (%p5020_p12) target bundleno = 1255 (0x4e7), region = 56  ;;  %s373_s29 = scalar_lea.sflag (!%p5020_p12), [#allocation4], %s4620_s24 }
  0x96   : > { %s3853_s12 = smul.u32 (!%p5020_p12), 320, %s4620_s24 }
  0x98   : > { %s4624_s22 = scalar_lea.vmem (!%p5020_p12), [#allocation3], %s3853_s12 }
  0x9c   : > { %4280 = dma.done.wait (%p5021_p1), %s373_s29, 5120  }
  0x9d   : > { %4282 = vsyncadd (%p5021_p1), %s373_s29, 4294962176  ;;  %p5022_p11 = scmp.ne.s32.totalorder %s5009_s17, 0 }
  0x9f   : > { %4284 = dma.done.wait (%p5022_p11), [#allocation7], 10240  }
  0xa0   : > { %4286 = vsyncadd (%p5022_p11), [#allocation7], 4294957056 }
  0xa1   : > { %4288 = dma.done.wait (%p5022_p11), [#allocation10], 2048  }
  0xa2   : > { %4290 = vsyncadd (%p5022_p11), [#allocation10], 4294965248  ;;  %v4328_v0 = vmov 0.0   ;;  %v3965_v1 = vld [vmem:[#allocation6] sm:$0xff]   ;;  %v3966_v2 = vld [vmem:[#allocation6 + $0x8] sm:$0xff]   ;;  %vm4329_vm0 = vmmov 0  }
  0xa3   : > { %451 = vst [vmem:[#allocation2 + $0xb0] sm:$0x1] %v4328_v0  ;;  %452 = vst [vmem:[#allocation2 + $0xc0] sm:$0x1] %v4328_v0  ;;  %3379 = vmatprep.subr.bf16.mxu1 %v3965_v1  ;;  %v3967_v3 = vld [vmem:[#allocation6 + $0x10] sm:$0xff]   ;;  %v3968_v4 = vld [vmem:[#allocation6 + $0x18] sm:$0xff]  }
  0xa4   : > { %453 = vst [vmem:[#allocation2 + $0xd0] sm:$0x1] %v4328_v0  ;;  %454 = vst [vmem:[#allocation2 + $0xe0] sm:$0x1] %v4328_v0  ;;  %3380 = vmatpush3.bf16.msra.mxu1 %v3965_v1  ;;  %v3022_v5 = vld [vmem:[%s4624_s22 + $0x8] sm:$0xff]  ;;  %v3023_v6 = vld [vmem:[%s4624_s22 + $0x10] sm:$0xff] }
  0xa5   : > { %455 = vst [vmem:[#allocation2 + $0xf0] sm:$0x1] %v4328_v0  ;;  %456 = vst [vmem:[#allocation2 + $0x100] sm:$0x1] %v4328_v0  ;;  %3381 = vmatprep.subr.bf16.mxu1 %v3966_v2  ;;  %v521_v7 = vpack.c.bf16 %v3023_v6, %v3022_v5  ;;  %v3969_v8 = vld [vmem:[#allocation6 + $0x20] sm:$0xff]   ;;  %v3970_v9 = vld [vmem:[#allocation6 + $0x28] sm:$0xff]  }
  0xa6   : > { %457 = vst [vmem:[#allocation2 + $0x110] sm:$0x1] %v4328_v0  ;;  %458 = vst [vmem:[#allocation2 + $0x120] sm:$0x1] %v4328_v0  ;;  %v3971_v10 = vld [vmem:[#allocation6 + $0x30] sm:$0xff]   ;;  %v3972_v11 = vld [vmem:[#allocation6 + $0x38] sm:$0xff]  }
  0xa7   : > { %493 = vst [vmem:[#allocation2 + $0x1f0] sm:$0x1] %v4328_v0  ;;  %494 = vst [vmem:[#allocation2 + $0x200] sm:$0x1] %v4328_v0  ;;  %3395 = vmatprep.mubr.bf16.mxu1 %v521_v7  ;;  %v3024_v12 = vld [vmem:[%s4624_s22 + $0x18] sm:$0xff]  ;;  %v3025_v13 = vld [vmem:[%s4624_s22 + $0x20] sm:$0xff] }
  0xa8   : > { %495 = vst [vmem:[#allocation2 + $0x210] sm:$0x1] %v4328_v0  ;;  %496 = vst [vmem:[#allocation2 + $0x220] sm:$0x1] %v4328_v0  ;;  %3382 = vmatpush3.bf16.msra.mxu1 %v3966_v2  ;;  %v3973_v14 = vld [vmem:[#allocation6] sm:$0xff]   ;;  %v3026_v15 = vld [vmem:[%s4624_s22 + $0x28] sm:$0xff]  ;;  %v522_v17 = vpack.c.bf16 %v3025_v13, %v3024_v12 }
  0xa9   : > { %497 = vst [vmem:[#allocation2 + $0x230] sm:$0x1] %v4328_v0  ;;  %498 = vst [vmem:[#allocation2 + $0x240] sm:$0x1] %v4328_v0  ;;  %3383 = vmatprep.subr.bf16.mxu1 %v3967_v3  ;;  %v3027_v16 = vld [vmem:[%s4624_s22 + $0x30] sm:$0xff]  ;;  %v3974_v19 = vld [vmem:[#allocation6 + $0x8] sm:$0xff]  }
  0xaa   : > { %499 = vst [vmem:[#allocation2 + $0x250] sm:$0x1] %v4328_v0  ;;  %500 = vst [vmem:[#allocation2 + $0x260] sm:$0x1] %v4328_v0  ;;  %v523_v18 = vpack.c.bf16 %v3027_v16, %v3026_v15  ;;  %v3028_v20 = vld [vmem:[%s4624_s22 + $0x38] sm:$0xff]  ;;  %v3029_v21 = vld [vmem:[%s4624_s22 + $0x40] sm:$0xff] }
  0xab   : > { %v3975_v22 = vld [vmem:[#allocation6 + $0x10] sm:$0xff]   ;;  %v3039_v23 = vld [vmem:[%s4624_s22 + $0x58] sm:$0xff]  ;;  %v3040_v24 = vld [vmem:[%s4624_s22 + $0x60] sm:$0xff]  ;;  %v524_v25 = vpack.c.bf16 %v3029_v21, %v3028_v20  ;;  %s5023_s28 = sld [smem:[#allocation20_spill]]  ;;  %s5024_s18 = sld [smem:[#allocation21_spill]] }
  0xac   : > { %3384 = vmatpush3.bf16.msra.mxu1 %v3967_v3  ;;  %v687_v26 = vpack.c.bf16 %v3040_v24, %v3039_v23  ;;  %v3976_v27 = vld [vmem:[#allocation6 + $0x18] sm:$0xff]   ;;  %v3977_v28 = vld [vmem:[#allocation6 + $0x20] sm:$0xff]   ;;  %v3978_v29 = vld [vmem:[#allocation6 + $0x28] sm:$0xff]   ;;  %s3021_s20 = sshll.u32 %s4620_s24, 6  ;;  %s5025_s26 = sld [smem:[#allocation18_spill]] }
  0xad   : > { %3385 = vmatprep.subr.bf16.mxu1 %v3968_v4  ;;  %v3979_v30 = vld [vmem:[#allocation6 + $0x30] sm:$0xff]   ;;  %v3980_v31 = vld [vmem:[#allocation6 + $0x38] sm:$0xff]   ;;  %v3041_v32 = vld [vmem:[%s4624_s22 + $0x68] sm:$0xff]  ;;  %s426_s6 = scalar_lea.vmem [#allocation12], %s3021_s20  ;;  %s5026_s19 = sld [smem:[#allocation22_spill]] }
  0xae   : > { %v3042_v33 = vld [vmem:[%s4624_s22 + $0x70] sm:$0xff]  ;;  %v3043_v34 = vld [vmem:[%s4624_s22 + $0x78] sm:$0xff]  ;;  %v3044_v35 = vld [vmem:[%s4624_s22 + $0x80] sm:$0xff]  ;;  %s2882_s12 = sshll.u32 %s426_s6, 4  ;;  %s2867_s15 = scalar_lea.sflag [#allocation5], %s4620_s24  ;;  %s4933_s12 = int_to_ptr.vmem [resolvable:$true] %s2882_s12 }
  0xaf   : > { %v3981_v36 = vld [vmem:[#allocation6] sm:$0xff]   ;;  %v688_v37 = vpack.c.bf16 %v3042_v33, %v3041_v32  ;;  %v689_v38 = vpack.c.bf16 %v3044_v35, %v3043_v34  ;;  %v3982_v39 = vld [vmem:[#allocation6 + $0x8] sm:$0xff]   ;;  %v3046_v41 = vld [vmem:[%s4624_s22 + $0x90] sm:$0xff]  ;;  %s4227_s27 = scalar_lea.vmem %s4933_s12, 1024  ;;  %s4330_s23 = smov [#allocation12]  }
  0xb0   : > { %3386 = vmatpush3.bf16.msra.mxu1 %v3968_v4  ;;  %v3045_v40 = vld [vmem:[%s4624_s22 + $0x88] sm:$0xff]  ;;  %v3983_v42 = vld [vmem:[#allocation6 + $0x10] sm:$0xff]   ;;  %v3984_v44 = vld [vmem:[#allocation6 + $0x18] sm:$0xff]   ;;  %p4228_p8 = scmp.ne.s32.totalorder %s4933_s12, %s4227_s27 }
  0xb1   : > { %3387 = vmatprep.subr.bf16.mxu1 %v3969_v8  ;;  %v690_v43 = vpack.c.bf16 %v3046_v41, %v3045_v40  ;;  %v3985_v45 = vld [vmem:[#allocation6 + $0x20] sm:$0xff]   ;;  %v3986_v46 = vld [vmem:[#allocation6 + $0x28] sm:$0xff]   ;;  %v3987_v47 = vld [vmem:[#allocation6 + $0x30] sm:$0xff]  }
  0xb2   : > { %v3988_v48 = vld [vmem:[#allocation6 + $0x38] sm:$0xff]   ;;  %v3056_v49 = vld [vmem:[%s4624_s22 + $0xa0] sm:$0xff]  ;;  %v3057_v50 = vld [vmem:[%s4624_s22 + $0xa8] sm:$0xff]  ;;  %s3196_s29 = sshll.u32 %s5025_s26, 10  ;;  %p4229_p6 = pnand %p4228_p8, %p4567_p5 }
  0xb3   : > { %v3989_v51 = vld [vmem:[#allocation6] sm:$0xff]   ;;  %v854_v52 = vpack.c.bf16 %v3057_v50, %v3056_v49  ;;  %v3990_v53 = vld [vmem:[#allocation6 + $0x8] sm:$0xff]   ;;  %v3058_v54 = vld [vmem:[%s4624_s22 + $0xb0] sm:$0xff]  ;;  %s4938_s21 = scalar_lea.hbm %s5026_s19, %s3196_s29 }
  0xb4   : > { %3388 = vmatpush3.bf16.msra.mxu1 %v3969_v8  ;;  %v3059_v55 = vld [vmem:[%s4624_s22 + $0xb8] sm:$0xff]  ;;  %v3991_v57 = vld [vmem:[#allocation6 + $0x10] sm:$0xff]   ;;  %v3060_v58 = vld [vmem:[%s4624_s22 + $0xc0] sm:$0xff]  ;;  %p4230_p10 = pneg %p4229_p6 }
  0xb5   : > { %3389 = vmatprep.subr.bf16.mxu1 %v3970_v9  ;;  %v855_v56 = vpack.c.bf16 %v3059_v55, %v3058_v54  ;;  %v3061_v59 = vld [vmem:[%s4624_s22 + $0xc8] sm:$0xff]  ;;  %v3992_v60 = vld [vmem:[#allocation6 + $0x18] sm:$0xff]   ;;  %v3993_v62 = vld [vmem:[#allocation6 + $0x20] sm:$0xff]  }
  0xb6   : > { %v856_v61 = vpack.c.bf16 %v3061_v59, %v3060_v58  ;;  %v3062_v63 = vld [vmem:[%s4624_s22 + $0xd0] sm:$0xff]  ;;  %v3063_v1 = vld [vmem:[%s4624_s22 + $0xd8] sm:$0xff]  ;;  %v3994_v2 = vld [vmem:[#allocation6 + $0x28] sm:$0xff]  }
  0xb7   : > { %v857_v3 = vpack.c.bf16 %v3063_v1, %v3062_v63  ;;  %v3995_v4 = vld [vmem:[#allocation6 + $0x30] sm:$0xff]   ;;  %v3064_v5 = vld [vmem:[%s4624_s22 + $0xe0] sm:$0xff]  ;;  %v3996_v6 = vld [vmem:[#allocation6 + $0x38] sm:$0xff]  }
  0xb8   : > { %3390 = vmatpush3.bf16.msra.mxu1 %v3970_v9  ;;  %v858_v7 = vpack.c.bf16 %v3064_v5, %v3064_v5  ;;  %v3074_v8 = vld [vmem:[%s4624_s22 + $0xf0] sm:$0xff]  ;;  %v3075_v9 = vld [vmem:[%s4624_s22 + $0xf8] sm:$0xff]  ;;  %v3077_v12 = vld [vmem:[%s4624_s22 + $0x108] sm:$0xff] }
  0xb9   : > { %3391 = vmatprep.subr.bf16.mxu1 %v3971_v10  ;;  %v3079_v15 = vld [vmem:[%s4624_s22 + $0x118] sm:$0xff]  ;;  %v3082_v20 = vld [vmem:[%s4624_s22 + $0x130] sm:$0xff]  ;;  %v3997_v21 = vld [vmem:[#allocation8 + $0x40] sm:$0xff]  }
  0xba   : > { %v1034_v23 = vpack.c.bf16 %v3082_v20, %v3082_v20  ;;  %v3999_v24 = vld [vmem:[#allocation8 + $0x50] sm:$0xff]   ;;  %v4008_v33 = vld [vmem:[#allocation8 + $0x18] sm:$0xff]   ;;  %v4009_v34 = vld [vmem:[#allocation8 + $0x20] sm:$0xff]  }
  0xbb   : > { %v4007_v32 = vld [vmem:[#allocation8 + $0x10] sm:$0xff]   ;;  %v4010_v35 = vld [vmem:[#allocation8 + $0x28] sm:$0xff]  }
  0xbc   : > { %3392 = vmatpush3.bf16.msra.mxu1 %v3971_v10  ;;  %v1030_v10 = vpack.c.bf16 %v3075_v9, %v3074_v8 }
  0xbd   : > { %3393 = vmatprep.subr.bf16.mxu1 %v3972_v11 }
  0xc0   : > { %3394 = vmatpush3.bf16.msra.mxu1 %v3972_v11  ;;  %v3076_v11 = vld [vmem:[%s4624_s22 + $0x100] sm:$0xff] }
  0xc1   : > { %3403 = vmatprep.subr.bf16.mxu1 %v3973_v14  ;;  %v1031_v13 = vpack.c.bf16 %v3077_v12, %v3076_v11 }
  0xc3   : > { %3396 = vmatmul.mubr.bf16.vlgmr.msra.gmra.mrb[0].mxu1 %v522_v17  ;;  %v3080_v17 = vld [vmem:[%s4624_s22 + $0x120] sm:$0xff] }
  0xc4   : > { %3404 = vmatpush3.bf16.msra.mxu1 %v3973_v14  ;;  %3399 = vmatprep.mubr.bf16.mxu1 %v523_v18  ;;  %v3078_v14 = vld [vmem:[%s4624_s22 + $0x110] sm:$0xff]  ;;  %v3081_v18 = vld [vmem:[%s4624_s22 + $0x128] sm:$0xff] }
  0xc5   : > { %3405 = vmatprep.subr.bf16.mxu1 %v3974_v19  ;;  %v1032_v16 = vpack.c.bf16 %v3079_v15, %v3078_v14 }
  0xc8   : > { %3406 = vmatpush3.bf16.msra.mxu1 %v3974_v19  ;;  %v1033_v19 = vpack.c.bf16 %v3081_v18, %v3080_v17 }
  0xc9   : > { %3407 = vmatprep.subr.bf16.mxu1 %v3975_v22 }
  0xcb   : > { %3400 = vmatmul.mubr.bf16.gmra.mrb[4].mxu1 %v524_v25  ;;  %v4000_v25 = vld [vmem:[#allocation8 + $0x58] sm:$0xff]  }
  0xcc   : > { %3408 = vmatpush3.bf16.msra.mxu1 %v3975_v22  ;;  %3419 = vmatprep.mubr.bf16.mxu1 %v687_v26  ;;  %v3998_v22 = vld [vmem:[#allocation8 + $0x48] sm:$0xff]   ;;  %v4001_v26 = vld [vmem:[#allocation8 + $0x60] sm:$0xff]  }
  0xcd   : > { %3409 = vmatprep.subr.bf16.mxu1 %v3976_v27 }
  0xd0   : > { %3410 = vmatpush3.bf16.msra.mxu1 %v3976_v27  ;;  %v4002_v27 = vld [vmem:[#allocation8 + $0x68] sm:$0xff]  }
  0xd1   : > { %3411 = vmatprep.subr.bf16.mxu1 %v3977_v28 }
  0xd4   : > { %3412 = vmatpush3.bf16.msra.mxu1 %v3977_v28  ;;  %v4003_v28 = vld [vmem:[#allocation8 + $0x70] sm:$0xff]  }
  0xd5   : > { %3413 = vmatprep.subr.bf16.mxu1 %v3978_v29 }
  0xd8   : > { %3414 = vmatpush3.bf16.msra.mxu1 %v3978_v29  ;;  %v4004_v29 = vld [vmem:[#allocation8 + $0x78] sm:$0xff]  }
  0xd9   : > { %3415 = vmatprep.subr.bf16.mxu1 %v3979_v30 }
  0xdc   : > { %3416 = vmatpush3.bf16.msra.mxu1 %v3979_v30  ;;  %v4005_v30 = vld [vmem:[#allocation8] sm:$0xff]  }
  0xdd   : > { %3417 = vmatprep.subr.bf16.mxu1 %v3980_v31  ;;  %3523 = vmatprep.subr.bf16.mxu0 %v4005_v30 }
  0xde   : > { %3524 = vmatpush3.bf16.msra.mxu0 %v4005_v30 }
  0xe0   : > { %3418 = vmatpush3.bf16.msra.mxu1 %v3980_v31  ;;  %v4006_v31 = vld [vmem:[#allocation8 + $0x8] sm:$0xff]  }
  0xe1   : > { %3427 = vmatprep.subr.bf16.mxu1 %v4328_v0  ;;  %3525 = vmatprep.subr.bf16.mxu0 %v4006_v31 }
  0xe2   : > { %3526 = vmatpush3.bf16.msra.mxu0 %v4006_v31 }
  0xe3   : > { %3420 = vmatmul.mubr.bf16.vlgmr.msra.gmra.mrb[8].mxu1 %v688_v37  ;;  %3527 = vmatprep.subr.bf16.mxu0 %v4007_v32  ;;  %v4012_v37 = vld [vmem:[#allocation8 + $0x38] sm:$0xff]  }
  0xe4   : > { %3428 = vmatpush3.bf16.msra.mxu1 %v3981_v36  ;;  %3423 = vmatprep.mubr.bf16.mxu1 %v689_v38  ;;  %v4011_v36 = vld [vmem:[#allocation8 + $0x30] sm:$0xff]   ;;  %v4727_v38 = vld [vmem:[%s4989_s2] ss:$0 sm:$0xff] }
  0xe5   : > { %3429 = vmatprep.subr.bf16.mxu1 %v4328_v0 }
  0xe6   : > { %3528 = vmatpush3.bf16.msra.mxu0 %v4007_v32 }
  0xe7   : > { %3529 = vmatprep.subr.bf16.mxu0 %v4008_v33 }
  0xe8   : > { %3430 = vmatpush3.bf16.msra.mxu1 %v3982_v39  ;;  %v4729_v39 = vld [vmem:[#allocation8 + $0x80] sm:$0xff]  }
  0xe9   : > { %3431 = vmatprep.subr.bf16.mxu1 %v4328_v0 }
  0xea   : > { %3530 = vmatpush3.bf16.msra.mxu0 %v4008_v33 }
  0xeb   : > { %3424 = vmatmul.mubr.bf16.gmra.mrb[12].mxu1 %v690_v43  ;;  %3531 = vmatprep.subr.bf16.mxu0 %v4009_v34 }
  0xec   : > { %3432 = vmatpush3.bf16.msra.mxu1 %v3983_v42  ;;  %3443 = vmatprep.mubr.msk.bf16.mxu1 %vm4329_vm0, %v4328_v0 }
  0xed   : > { %3433 = vmatprep.subr.bf16.mxu1 %v4328_v0 }
  0xee   : > { %3532 = vmatpush3.bf16.msra.mxu0 %v4009_v34 }
  0xef   : > { %3533 = vmatprep.subr.bf16.mxu0 %v4010_v35 }
  0xf0   : > { %3434 = vmatpush3.bf16.msra.mxu1 %v3984_v44 }
  0xf1   : > { %3435 = vmatprep.subr.bf16.mxu1 %v4328_v0 }
  0xf2   : > { %3534 = vmatpush3.bf16.msra.mxu0 %v4010_v35 }
  0xf3   : > { %3535 = vmatprep.subr.bf16.mxu0 %v4011_v36 }
  0xf4   : > { %3436 = vmatpush3.bf16.msra.mxu1 %v3985_v45 }
  0xf5   : > { %3437 = vmatprep.subr.bf16.mxu1 %v4328_v0 }
  0xf6   : > { %3536 = vmatpush3.bf16.msra.mxu0 %v4011_v36 }
  0xf7   : > { %3537 = vmatprep.subr.bf16.mxu0 %v4012_v37 }
  0xf8   : > { %3438 = vmatpush3.bf16.msra.mxu1 %v3986_v46 }
  0xf9   : > { %3439 = vmatprep.subr.bf16.mxu1 %v4328_v0 }
  0xfa   : > { %3538 = vmatpush3.bf16.msra.mxu0 %v4012_v37 }
  0xfb   : > { %3547 = vmatprep.subr.bf16.mxu0 %v4729_v39 }
  0xfc   : > { %3440 = vmatpush3.bf16.msra.mxu1 %v3987_v47 }
  0xfd   : > { %3441 = vmatprep.subr.bf16.mxu1 %v4328_v0 }
 0x100   : > { %3442 = vmatpush3.bf16.msra.mxu1 %v3988_v48 }
 0x101   : > { %3463 = vmatprep.subr.bf16.mxu1 %v4328_v0 }
 0x103   : > { %3444 = vmatmul.mubr.bf16.vlgmr.msra.gmra.mrb[16].mxu1 %v854_v52 }
 0x104   : > { %3464 = vmatpush3.bf16.msra.mxu1 %v3989_v51  ;;  %3447 = vmatprep.mubr.msk.bf16.mxu1 %vm4329_vm0, %v4328_v0 }
 0x105   : > { %3465 = vmatprep.subr.bf16.mxu1 %v4328_v0 }
 0x108   : > { %3466 = vmatpush3.bf16.msra.mxu1 %v3990_v53 }
 0x109   : > { %3467 = vmatprep.subr.bf16.mxu1 %v4328_v0 }
 0x10b   : > { %3448 = vmatmul.mubr.bf16.gmra.mrb[20].mxu1 %v855_v56 }
 0x10c   : > { %3468 = vmatpush3.bf16.msra.mxu1 %v3991_v57  ;;  %3451 = vmatprep.mubr.msk.bf16.mxu1 %vm4329_vm0, %v4328_v0 }
 0x10d   : > { %3469 = vmatprep.subr.bf16.mxu1 %v4328_v0 }
 0x110   : > { %3470 = vmatpush3.bf16.msra.mxu1 %v3992_v60 }
 0x111   : > { %3471 = vmatprep.subr.bf16.mxu1 %v4328_v0 }
 0x113   : > { %3452 = vmatmul.mubr.bf16.gmra.mrb[24].mxu1 %v856_v61 }
 0x114   : > { %3472 = vmatpush3.bf16.msra.mxu1 %v3993_v62  ;;  %3455 = vmatprep.mubr.msk.bf16.mxu1 %vm4329_vm0, %v4328_v0 }
 0x115   : > { %3473 = vmatprep.subr.bf16.mxu1 %v4328_v0 }
 0x118   : > { %3474 = vmatpush3.bf16.msra.mxu1 %v3994_v2 }
 0x119   : > { %3475 = vmatprep.subr.bf16.mxu1 %v4328_v0 }
 0x11b   : > { %3456 = vmatmul.mubr.bf16.gmra.mrb[28].mxu1 %v857_v3 }
 0x11c   : > { %3459 = vmatprep.mubr.msk.bf16.mxu1 %vm4329_vm0, %v4328_v0  ;;  %3476 = vmatpush3.bf16.msra.mxu1 %v3995_v4 }
 0x11d   : > { %3477 = vmatprep.subr.bf16.mxu1 %v4328_v0 }
 0x120   : > { %3478 = vmatpush3.bf16.msra.mxu1 %v3996_v6 }
 0x121   : > { %3499 = vmatprep.subr.bf16.mxu1 %v3997_v21 }
 0x123   : > { %3460 = vmatmul.mubr.bf16.gmra.mrb[32].mxu1 %v858_v7 }
 0x124   : > { %3479 = vmatprep.mubr.msk.bf16.mxu1 %vm4329_vm0, %v4328_v0 }
 0x12b   : > { %3480 = vmatmul.mubr.bf16.vlgmr.msra.gmra.mrb[36].mxu1 %v1030_v10 }
 0x12c   : > { %3483 = vmatprep.mubr.msk.bf16.mxu1 %vm4329_vm0, %v4328_v0  ;;  %3500 = vmatpush3.bf16.msra.mxu1 %v3997_v21 }
 0x12d   : > { %3501 = vmatprep.subr.bf16.mxu1 %v3998_v22 }
 0x130   : > { %3502 = vmatpush3.bf16.msra.mxu1 %v3998_v22 }
 0x131   : > { %3503 = vmatprep.subr.bf16.mxu1 %v3999_v24 }
 0x133   : > { %3484 = vmatmul.mubr.bf16.gmra.mrb[40].mxu1 %v1031_v13 }
 0x134   : > { %3487 = vmatprep.mubr.msk.bf16.mxu1 %vm4329_vm0, %v4328_v0  ;;  %3504 = vmatpush3.bf16.msra.mxu1 %v3999_v24 }
 0x135   : > { %3505 = vmatprep.subr.bf16.mxu1 %v4000_v25 }
 0x138   : > { %3506 = vmatpush3.bf16.msra.mxu1 %v4000_v25 }
 0x139   : > { %3507 = vmatprep.subr.bf16.mxu1 %v4001_v26 }
 0x13b   : > { %3488 = vmatmul.mubr.bf16.gmra.mrb[44].mxu1 %v1032_v16 }
 0x13c   : > { %3491 = vmatprep.mubr.msk.bf16.mxu1 %vm4329_vm0, %v4328_v0  ;;  %3508 = vmatpush3.bf16.msra.mxu1 %v4001_v26 }
 0x13d   : > { %3509 = vmatprep.subr.bf16.mxu1 %v4002_v27 }
 0x140   : > { %3510 = vmatpush3.bf16.msra.mxu1 %v4002_v27 }
 0x141   : > { %3511 = vmatprep.subr.bf16.mxu1 %v4003_v28 }
 0x143   : > { %3492 = vmatmul.mubr.bf16.gmra.mrb[48].mxu1 %v1033_v19 }
 0x144   : > { %3495 = vmatprep.mubr.msk.bf16.mxu1 %vm4329_vm0, %v4328_v0  ;;  %3512 = vmatpush3.bf16.msra.mxu1 %v4003_v28 }
 0x145   : > { %3513 = vmatprep.subr.bf16.mxu1 %v4004_v29 }
 0x148   : > { %3514 = vmatpush3.bf16.msra.mxu1 %v4004_v29 }
 0x14b   : > { %3496 = vmatmul.mubr.bf16.gmra.mrb[52].mxu1 %v1034_v23 }
 0x196   : > { %v3397_v40 = vpop.f32.mrb[0].mxu1 }
 0x197   : > { %v639_v41 = vadd.f32 %v3397_v40, %v4727_v38  ;;  %v630_v42 = vpop.f32.mrb[1].mxu1 }
 0x198   : > { %v631_v43 = vadd.f32 %v4727_v38, %v630_v42  ;;  %v3398_v44 = vpop.f32.mrb[2].mxu1 }
 0x199   : > { %v663_v45 = vmax.f32 %v639_v41, 0.0  ;;  %v642_v46 = vadd.f32 %v3398_v44, %v4727_v38  ;;  %v633_v47 = vpop.f32.mrb[3].mxu1 }
 0x19a   : > { %v661_v48 = vmax.f32 %v631_v43, 0.0  ;;  %v634_v49 = vadd.f32 %v4727_v38, %v633_v47 }
 0x19b   : > { %v664_v50 = vmax.f32 %v642_v46, 0.0 }
 0x19c   : > { %v662_v51 = vmax.f32 %v634_v49, 0.0 }
 0x19d   : > { %v4736_v52 = vpack.c.bf16 %v664_v50, %v663_v45 }
 0x19e   : > { %v3401_v53 = vpop.f32.mrb[4].mxu1  ;;  %v4738_v54 = vpack.c.bf16 %v662_v51, %v661_v48 }
 0x19f   : > { %v655_v55 = vadd.f32 %v3401_v53, %v4727_v38  ;;  %v646_v56 = vpop.f32.mrb[5].mxu1 }
 0x1a0   : > { %v647_v57 = vadd.f32 %v4727_v38, %v646_v56  ;;  %v3402_v58 = vpop.f32.mrb[6].mxu1 }
 0x1a1   : > { %v667_v59 = vmax.f32 %v655_v55, 0.0  ;;  %v658_v60 = vadd.f32 %v3402_v58, %v4727_v38  ;;  %v649_v61 = vpop.f32.mrb[7].mxu1 }
 0x1a2   : > { %v665_v62 = vmax.f32 %v647_v57, 0.0  ;;  %v650_v63 = vadd.f32 %v4727_v38, %v649_v61 }
 0x1a3   : > { %v668_v1 = vmax.f32 %v658_v60, 0.0 }
 0x1a4   : > { %v666_v2 = vmax.f32 %v650_v63, 0.0 }
 0x1a5   : > { %v4744_v3 = vpack.c.bf16 %v668_v1, %v667_v59 }
 0x1a6   : > { %v4746_v4 = vpack.c.bf16 %v666_v2, %v665_v62 }
 0x1b6   : > { %v3421_v5 = vpop.f32.mrb[8].mxu1 }
 0x1b7   : > { %v805_v6 = vadd.f32 %v3421_v5, %v4727_v38  ;;  %v796_v7 = vpop.f32.mrb[9].mxu1 }
 0x1b8   : > { %v797_v8 = vadd.f32 %v4727_v38, %v796_v7  ;;  %v3422_v9 = vpop.f32.mrb[10].mxu1 }
 0x1b9   : > { %v829_v10 = vmax.f32 %v805_v6, 0.0  ;;  %v808_v11 = vadd.f32 %v3422_v9, %v4727_v38  ;;  %v799_v12 = vpop.f32.mrb[11].mxu1 }
 0x1ba   : > { %v827_v13 = vmax.f32 %v797_v8, 0.0  ;;  %v800_v14 = vadd.f32 %v4727_v38, %v799_v12 }
 0x1bb   : > { %838 = vst [vmem:[#allocation2 + $0xd1] sm:$0xff] %v829_v10  ;;  %v830_v15 = vmax.f32 %v808_v11, 0.0 }
 0x1bc   : > { %836 = vst [vmem:[#allocation2 + $0xb1] sm:$0xff] %v827_v13  ;;  %v828_v16 = vmax.f32 %v800_v14, 0.0 }
 0x1bd   : > { %839 = vst [vmem:[#allocation2 + $0xe1] sm:$0xff] %v830_v15  ;;  %v4752_v17 = vpack.c.bf16 %v830_v15, %v829_v10 }
 0x1be   : > { %837 = vst [vmem:[#allocation2 + $0xc1] sm:$0xff] %v828_v16  ;;  %v3425_v18 = vpop.f32.mrb[12].mxu1  ;;  %v4754_v19 = vpack.c.bf16 %v828_v16, %v827_v13 }
 0x1bf   : > { %v821_v20 = vadd.f32 %v3425_v18, %v4727_v38  ;;  %v812_v21 = vpop.f32.mrb[13].mxu1 }
 0x1c0   : > { %v813_v22 = vadd.f32 %v4727_v38, %v812_v21  ;;  %v3426_v23 = vpop.f32.mrb[14].mxu1 }
 0x1c1   : > { %v833_v24 = vmax.f32 %v821_v20, 0.0  ;;  %v824_v25 = vadd.f32 %v3426_v23, %v4727_v38  ;;  %v815_v26 = vpop.f32.mrb[15].mxu1 }
 0x1c2   : > { %v831_v27 = vmax.f32 %v813_v22, 0.0  ;;  %v816_v28 = vadd.f32 %v4727_v38, %v815_v26 }
 0x1c3   : > { %842 = vst [vmem:[#allocation2 + $0x111] sm:$0xff] %v833_v24  ;;  %v834_v29 = vmax.f32 %v824_v25, 0.0 }
 0x1c4   : > { %840 = vst [vmem:[#allocation2 + $0xf1] sm:$0xff] %v831_v27  ;;  %v832_v30 = vmax.f32 %v816_v28, 0.0 }
 0x1c5   : > { %843 = vst [vmem:[#allocation2 + $0x121] sm:$0xff] %v834_v29  ;;  %v4760_v31 = vpack.c.bf16 %v834_v29, %v833_v24 }
 0x1c6   : > { %841 = vst [vmem:[#allocation2 + $0x101] sm:$0xff] %v832_v30  ;;  %v4762_v32 = vpack.c.bf16 %v832_v30, %v831_v27 }
 0x1d6   : > { %v964_v33 = vpop.f32.mrb[16].mxu1 }
 0x1d7   : > { %v965_v34 = vadd.f32 %v4727_v38, %v964_v33  ;;  %v3445_v35 = vpop.f32.mrb[17].mxu1 }
 0x1d8   : > { %v967_v36 = vpop.f32.mrb[18].mxu1 }
 0x1d9   : > { %v1002_v37 = vmax.f32 %v965_v34, 0.0  ;;  %v968_v40 = vadd.f32 %v4727_v38, %v967_v36  ;;  %v3446_v41 = vpop.f32.mrb[19].mxu1 }
 0x1db   : > { %1011 = vst [vmem:[#allocation2 + $0x141] sm:$0xff] %v1002_v37  ;;  %v1003_v42 = vmax.f32 %v968_v40, 0.0 }
 0x1dc   : > { %1200 = vst [vmem:[#allocation2 + $0x140] sm:$0xff] %v4328_v0  ;;  %1201 = vst [vmem:[#allocation2 + $0x148] sm:$0x3] %v4328_v0 }
 0x1de   : > { %v972_v43 = vpop.f32.mrb[20].mxu1 }
 0x1df   : > { %v973_v44 = vadd.f32 %v4727_v38, %v972_v43  ;;  %v3449_v45 = vpop.f32.mrb[21].mxu1 }
 0x1e0   : > { %v975_v46 = vpop.f32.mrb[22].mxu1 }
 0x1e1   : > { %v1004_v47 = vmax.f32 %v973_v44, 0.0  ;;  %v976_v48 = vadd.f32 %v4727_v38, %v975_v46  ;;  %v3450_v49 = vpop.f32.mrb[23].mxu1 }
 0x1e3   : > { %v1005_v50 = vmax.f32 %v976_v48, 0.0  ;;  %v1232_v51 = vld [vmem:[#allocation2 + $0x141] sm:$0xff]  ;;  %v4770_v53 = vpack.c.bf16 %v1004_v47, %v1003_v42 }
 0x1e4   : > { %v1240_v55 = vpack.c.bf16 %v1003_v42, %v1232_v51 }
 0x1e5   : > { %v1241_v56 = vpack.c.bf16 %v1005_v50, %v1004_v47 }
 0x1e6   : > { %v980_v57 = vpop.f32.mrb[24].mxu1  ;;  %3515 = vmatprep.mubr.bf16.mxu1 %v1240_v55 }
 0x1e7   : > { %v981_v58 = vadd.f32 %v4727_v38, %v980_v57  ;;  %v3453_v59 = vpop.f32.mrb[25].mxu1  ;;  %3516 = vmatmul.mubr.bf16.vlgmr.msra.gmra.mrb[56].mxu1 %v1241_v56 }
 0x1e8   : > { %v983_v60 = vpop.f32.mrb[26].mxu1 }
 0x1e9   : > { %v1006_v61 = vmax.f32 %v981_v58, 0.0  ;;  %v984_v62 = vadd.f32 %v4727_v38, %v983_v60  ;;  %v3454_v63 = vpop.f32.mrb[27].mxu1 }
 0x1eb   : > { %v1007_v1 = vmax.f32 %v984_v62, 0.0  ;;  %v4774_v2 = vpack.c.bf16 %v1006_v61, %v1005_v50 }
 0x1ed   : > { %v1242_v5 = vpack.c.bf16 %v1007_v1, %v1006_v61 }
 0x1ee   : > { %v988_v6 = vpop.f32.mrb[28].mxu1 }
 0x1ef   : > { %v989_v7 = vadd.f32 %v4727_v38, %v988_v6  ;;  %v3457_v8 = vpop.f32.mrb[29].mxu1  ;;  %3519 = vmatprep.mubr.bf16.mxu1 %v1242_v5 }
 0x1f0   : > { %v991_v9 = vpop.f32.mrb[30].mxu1 }
 0x1f1   : > { %v1008_v10 = vmax.f32 %v989_v7, 0.0  ;;  %v992_v11 = vadd.f32 %v4727_v38, %v991_v9  ;;  %v3458_v12 = vpop.f32.mrb[31].mxu1 }
 0x1f3   : > { %v1009_v13 = vmax.f32 %v992_v11, 0.0  ;;  %v4778_v14 = vpack.c.bf16 %v1008_v10, %v1007_v1  ;;  %v4014_v1 = vld [vmem:[#allocation8 + $0x88] sm:$0xff]  }
 0x1f5   : > { %v1243_v15 = vpack.c.bf16 %v1009_v13, %v1008_v10 }
 0x1f6   : > { %v996_v16 = vpop.f32.mrb[32].mxu1 }
 0x1f7   : > { %v997_v18 = vadd.f32 %v4727_v38, %v996_v16  ;;  %v3461_v20 = vpop.f32.mrb[33].mxu1  ;;  %3520 = vmatmul.mubr.bf16.gmra.mrb[60].mxu1 %v1243_v15 }
 0x1f8   : > { %v999_v21 = vpop.f32.mrb[34].mxu1 }
 0x1f9   : > { %v1010_v22 = vmax.f32 %v997_v18, 0.0  ;;  %v3462_v23 = vpop.f32.mrb[35].mxu1  ;;  %v4016_v21 = vld [vmem:[#allocation8 + $0x98] sm:$0xff]  }
 0x1fb   : > { %v4781_v24 = vpack.c.bf16 %v1010_v22, %v1009_v13  ;;  %v4015_v13 = vld [vmem:[#allocation8 + $0x90] sm:$0xff]  }
 0x1fe   : > { %v1140_v25 = vpop.f32.mrb[36].mxu1 }
 0x1ff   : > { %v1141_v26 = vadd.f32 %v4727_v38, %v1140_v25  ;;  %v3481_v27 = vpop.f32.mrb[37].mxu1 }
 0x200   : > { %v1143_v28 = vpop.f32.mrb[38].mxu1 }
 0x201   : > { %v1178_v29 = vmax.f32 %v1141_v26, 0.0  ;;  %v1144_v30 = vadd.f32 %v4727_v38, %v1143_v28  ;;  %v3482_v33 = vpop.f32.mrb[39].mxu1 }
 0x203   : > { %1187 = vst [vmem:[#allocation2 + $0x1e1] sm:$0xff] %v1178_v29  ;;  %v4785_v34 = vmax.f32 %v1144_v30, 0.0  ;;  %v4017_v30 = vld [vmem:[#allocation8 + $0xa0] sm:$0xff]  }
 0x204   : > { %1202 = vst [vmem:[#allocation2 + $0x1e0] sm:$0xff] %v4328_v0  ;;  %1203 = vst [vmem:[#allocation2 + $0x1e8] sm:$0x3] %v4328_v0 }
 0x205   : > { %1188 = vst [vmem:[#allocation2 + $0x1f1] sm:$0xff] %v4785_v34 }
 0x206   : > { %v1148_v35 = vpop.f32.mrb[40].mxu1 }
 0x207   : > { %v1149_v36 = vadd.f32 %v4727_v38, %v1148_v35  ;;  %v3485_v37 = vpop.f32.mrb[41].mxu1 }
 0x208   : > { %v1151_v40 = vpop.f32.mrb[42].mxu1 }
 0x209   : > { %v4791_v41 = vmax.f32 %v1149_v36, 0.0  ;;  %v1152_v42 = vadd.f32 %v4727_v38, %v1151_v40  ;;  %v3486_v43 = vpop.f32.mrb[43].mxu1 }
 0x20a   : > { %v4018_v43 = vld [vmem:[#allocation8 + $0xa8] sm:$0xff]  }
 0x20b   : > { %1189 = vst [vmem:[#allocation2 + $0x201] sm:$0xff] %v4791_v41  ;;  %v4795_v44 = vmax.f32 %v1152_v42, 0.0  ;;  %v2397_v45 = vpack.c.bf16 %v4791_v41, %v4785_v34  ;;  %v1487_v36 = vld [vmem:[#allocation2 + $0x1e1] sm:$0xff] }
 0x20c   : > { %v4799_v46 = vld [vmem:[#allocation2 + $0x1f0] sm:$0xff] }
 0x20d   : > { %1190 = vst [vmem:[#allocation2 + $0x211] sm:$0xff] %v4795_v44  ;;  %v1212_v47 = vpack.c.bf16 %v4799_v46, %v4328_v0  ;;  %v1496_v48 = vpack.c.bf16 %v4795_v44, %v4791_v41  ;;  %v4077_v41 = vld [vmem:[#allocation11] sm:$0xff]  }
 0x20e   : > { %v1156_v49 = vpop.f32.mrb[44].mxu1 }
 0x20f   : > { %v1157_v50 = vadd.f32 %v4727_v38, %v1156_v49  ;;  %3539 = vmatprep.mubr.bf16.mxu0 %v1212_v47  ;;  %v3489_v51 = vpop.f32.mrb[45].mxu1  ;;  %v1495_v47 = vpack.c.bf16 %v4785_v34, %v1487_v36  ;;  %v4019_v49 = vld [vmem:[#allocation8 + $0xb0] sm:$0xff]   ;;  %v4076_v34 = vld [vmem:[#allocation9 + $0x38] sm:$0xff]  }
 0x210   : > { %v1159_v55 = vpop.f32.mrb[46].mxu1  ;;  %v4021_v51 = vld [vmem:[#allocation8 + $0xc0] sm:$0xff]   ;;  %v4035_v36 = vld [vmem:[#allocation8 + $0x130] sm:$0xff]  }
 0x211   : > { %v4807_v56 = vmax.f32 %v1157_v50, 0.0  ;;  %v1160_v57 = vadd.f32 %v4727_v38, %v1159_v55  ;;  %v3490_v58 = vpop.f32.mrb[47].mxu1  ;;  %v4020_v50 = vld [vmem:[#allocation8 + $0xb8] sm:$0xff]   ;;  %v4022_v55 = vld [vmem:[#allocation8 + $0xc8] sm:$0xff]  }
 0x212   : > { %v4810_v59 = vld [vmem:[#allocation2 + $0x200] sm:$0xff] }
 0x213   : > { %1191 = vst [vmem:[#allocation2 + $0x221] sm:$0xff] %v4807_v56  ;;  %v4813_v60 = vmax.f32 %v1160_v57, 0.0  ;;  %v2096_v0 = vpack.c.bf16 %v4810_v59, %v4799_v46  ;;  %v2398_v61 = vpack.c.bf16 %v4807_v56, %v4795_v44  ;;  %v4023_v57 = vld [vmem:[#allocation8 + $0xd0] sm:$0xff]   ;;  %v1638_v58 = vld [vmem:[#allocation2 + $0xc0] sm:$0xff] }
 0x214   : > { %v4819_v62 = vld [vmem:[#allocation2 + $0x210] sm:$0xff]  ;;  %v3164_v44 = vld [vmem:[%s4991_s4] ss:$0 sm:$0xff] }
 0x215   : > { %1192 = vst [vmem:[#allocation2 + $0x231] sm:$0xff] %v4813_v60  ;;  %v1213_v63 = vpack.c.bf16 %v4819_v62, %v4810_v59  ;;  %v1497_v5 = vpack.c.bf16 %v4813_v60, %v4807_v56  ;;  %v4055_v46 = vld [vmem:[#allocation8 + $0x1d0] sm:$0xff]  }
 0x216   : > { %v1164_v6 = vpop.f32.mrb[48].mxu1 }
 0x217   : > { %v1165_v7 = vadd.f32 %v4727_v38, %v1164_v6  ;;  %v3493_v8 = vpop.f32.mrb[49].mxu1  ;;  %3540 = vmatmul.mubr.bf16.vlgmr.msra.gmra.mrb[0].mxu0 %v1213_v63  ;;  %v1637_v63 = vld [vmem:[#allocation2 + $0xb0] sm:$0xff] }
 0x218   : > { %3548 = vmatpush3.bf16.msra.mxu0 %v4729_v39  ;;  %v1167_v9 = vpop.f32.mrb[50].mxu1  ;;  %v1645_v6 = vpack.c.bf16 %v1638_v58, %v1637_v63  ;;  %v4026_v8 = vld [vmem:[#allocation8 + $0xe8] sm:$0xff]   ;;  %v4073_v58 = vld [vmem:[#allocation9 + $0x20] sm:$0xff]  }
 0x219   : > { %v4828_v10 = vmax.f32 %v1165_v7, 0.0  ;;  %v1168_v11 = vadd.f32 %v4727_v38, %v1167_v9  ;;  %3549 = vmatprep.subr.bf16.mxu0 %v4014_v1  ;;  %v3494_v12 = vpop.f32.mrb[51].mxu1  ;;  %v4025_v7 = vld [vmem:[#allocation8 + $0xe0] sm:$0xff]   ;;  %v4074_v63 = vld [vmem:[#allocation9 + $0x28] sm:$0xff]  }
 0x21a   : > { %v4831_v15 = vld [vmem:[#allocation2 + $0x220] sm:$0xff] }
 0x21b   : > { %1193 = vst [vmem:[#allocation2 + $0x241] sm:$0xff] %v4828_v10  ;;  %v1185_v16 = vmax.f32 %v1168_v11, 0.0  ;;  %v2097_v18 = vpack.c.bf16 %v4831_v15, %v4819_v62  ;;  %v2399_v20 = vpack.c.bf16 %v4828_v10, %v4813_v60  ;;  %v4029_v9 = vld [vmem:[#allocation8 + $0x100] sm:$0xff]   ;;  %v1639_v11 = vld [vmem:[#allocation2 + $0xd0] sm:$0xff]  ;;  %v4056_v62 = vld [vmem:[#allocation8 + $0x1d8] sm:$0xff]  }
 0x21c   : > { %3550 = vmatpush3.bf16.msra.mxu0 %v4014_v1  ;;  %v4838_v39 = vld [vmem:[#allocation2 + $0x230] sm:$0xff]  ;;  %v4024_v1 = vld [vmem:[#allocation8 + $0xd8] sm:$0xff]   ;;  %v1640_v12 = vld [vmem:[#allocation2 + $0xe0] sm:$0xff] }
 0x21d   : > { %1194 = vst [vmem:[#allocation2 + $0x251] sm:$0xff] %v1185_v16  ;;  %3551 = vmatprep.subr.bf16.mxu0 %v4015_v13  ;;  %v1214_v22 = vpack.c.bf16 %v4838_v39, %v4831_v15  ;;  %v1498_v23 = vpack.c.bf16 %v1185_v16, %v4828_v10 }
 0x21e   : > { %v1172_v25 = vpop.f32.mrb[52].mxu1 }
 0x21f   : > { %v1173_v26 = vadd.f32 %v4727_v38, %v1172_v25  ;;  %3543 = vmatprep.mubr.bf16.mxu0 %v1214_v22  ;;  %v3497_v27 = vpop.f32.mrb[53].mxu1  ;;  %v4030_v22 = vld [vmem:[#allocation8 + $0x108] sm:$0xff]   ;;  %v4031_v25 = vld [vmem:[#allocation8 + $0x110] sm:$0xff]  }
 0x220   : > { %3552 = vmatpush3.bf16.msra.mxu0 %v4015_v13  ;;  %v1175_v28 = vpop.f32.mrb[54].mxu1  ;;  %v1641_v13 = vld [vmem:[#allocation2 + $0xf0] sm:$0xff]  ;;  %v1644_v27 = vld [vmem:[#allocation2 + $0x120] sm:$0xff] }
 0x221   : > { %v1186_v29 = vmax.f32 %v1173_v26, 0.0  ;;  %3553 = vmatprep.subr.bf16.mxu0 %v4016_v21  ;;  %v3498_v33 = vpop.f32.mrb[55].mxu1  ;;  %v1643_v26 = vld [vmem:[#allocation2 + $0x110] sm:$0xff] }
 0x222   : > { %v4844_v35 = vld [vmem:[#allocation2 + $0x240] sm:$0xff]  ;;  %v1648_v28 = vpack.c.bf16 %v1644_v27, %v1643_v26  ;;  %v4034_v33 = vld [vmem:[#allocation8 + $0x128] sm:$0xff]   ;;  %v4064_v26 = vld [vmem:[#allocation8 + $0x218] sm:$0xff]  }
 0x223   : > { %1195 = vst [vmem:[#allocation2 + $0x261] sm:$0xff] %v1186_v29  ;;  %v2098_v37 = vpack.c.bf16 %v4844_v35, %v4838_v39  ;;  %v4848_v40 = vpack.c.bf16 %v1186_v29, %v1185_v16  ;;  %v1642_v16 = vld [vmem:[#allocation2 + $0x100] sm:$0xff]  ;;  %v4032_v29 = vld [vmem:[#allocation8 + $0x118] sm:$0xff]   ;;  %v4058_v39 = vld [vmem:[#allocation8 + $0x1e8] sm:$0xff]  }
 0x224   : > { %3554 = vmatpush3.bf16.msra.mxu0 %v4016_v21  ;;  %v4850_v42 = vld [vmem:[#allocation2 + $0x250] sm:$0xff]  ;;  %v1646_v21 = vpack.c.bf16 %v1640_v12, %v1639_v11  ;;  %v4065_v27 = vld [vmem:[#allocation8 + $0x220] sm:$0xff]  }
 0x225   : > { %3555 = vmatprep.subr.bf16.mxu0 %v4017_v30  ;;  %v1215_v38 = vpack.c.bf16 %v4850_v42, %v4844_v35  ;;  %v4059_v35 = vld [vmem:[#allocation8 + $0x1f0] sm:$0xff]  }
 0x227   : > { %3544 = vmatmul.mubr.bf16.gmra.mrb[4].mxu0 %v1215_v38  ;;  %v4036_v38 = vld [vmem:[#allocation8 + $0x138] sm:$0xff]  }
 0x228   : > { %3556 = vmatpush3.bf16.msra.mxu0 %v4017_v30  ;;  %3563 = vmatprep.mubr.bf16.mxu0 %v1495_v47  ;;  %v4033_v30 = vld [vmem:[#allocation8 + $0x120] sm:$0xff]   ;;  %v4038_v47 = vld [vmem:[#allocation8 + $0x148] sm:$0xff]  }
 0x229   : > { %3557 = vmatprep.subr.bf16.mxu0 %v4018_v43 }
 0x22a   : > { %v2095_v59 = vld [vmem:[#allocation2 + $0x260] sm:$0xff] }
 0x22c   : > { %3558 = vmatpush3.bf16.msra.mxu0 %v4018_v43  ;;  %v4037_v43 = vld [vmem:[#allocation8 + $0x140] sm:$0xff]  }
 0x22d   : > { %3559 = vmatprep.subr.bf16.mxu0 %v4019_v49 }
 0x230   : > { %3560 = vmatpush3.bf16.msra.mxu0 %v4019_v49  ;;  %v4040_v49 = vld [vmem:[#allocation8 + $0x158] sm:$0xff]  }
 0x231   : > { %3561 = vmatprep.subr.bf16.mxu0 %v4020_v50 }
 0x234   : > { %3562 = vmatpush3.bf16.msra.mxu0 %v4020_v50  ;;  %v4069_v50 = vld [vmem:[#allocation9] sm:$0xff]  }
 0x235   : > { %3571 = vmatprep.subr.bf16.mxu0 %v4021_v51  ;;  %3715 = vmatprep.subr.bf16.mxu1 %v4069_v50 }
 0x236   : > { %3716 = vmatpush3.bf16.msra.mxu1 %v4069_v50 }
 0x237   : > { %3564 = vmatmul.mubr.bf16.vlgmr.msra.gmra.mrb[0].mxu0 %v1496_v48  ;;  %v4027_v48 = vld [vmem:[#allocation8 + $0xf0] sm:$0xff]  }
 0x238   : > { %3567 = vmatprep.mubr.bf16.mxu0 %v1497_v5  ;;  %3572 = vmatpush3.bf16.msra.mxu0 %v4021_v51  ;;  %v4028_v5 = vld [vmem:[#allocation8 + $0xf8] sm:$0xff]   ;;  %v4070_v51 = vld [vmem:[#allocation9 + $0x8] sm:$0xff]  }
 0x239   : > { %3573 = vmatprep.subr.bf16.mxu0 %v4022_v55  ;;  %3717 = vmatprep.subr.bf16.mxu1 %v4070_v51 }
 0x23a   : > { %3718 = vmatpush3.bf16.msra.mxu1 %v4070_v51  ;;  %v4078_v51 = vld [vmem:[#allocation11 + $0x8] sm:$0xff]  }
 0x23c   : > { %3574 = vmatpush3.bf16.msra.mxu0 %v4022_v55  ;;  %v4041_v55 = vld [vmem:[#allocation8 + $0x160] sm:$0xff]  }
 0x23d   : > { %3575 = vmatprep.subr.bf16.mxu0 %v4023_v57 }
 0x23f   : > { %3568 = vmatmul.mubr.bf16.gmra.mrb[4].mxu0 %v1498_v23  ;;  %v1647_v23 = vpack.c.bf16 %v1642_v16, %v1641_v13  ;;  %v2099_v13 = vpack.c.bf16 %v2095_v59, %v4850_v42  ;;  %v4084_v59 = vld [vmem:[#allocation11 + $0x38] sm:$0xff]  }
 0x240   : > { %3576 = vmatpush3.bf16.msra.mxu0 %v4023_v57  ;;  %3587 = vmatprep.mubr.bf16.mxu0 %v1645_v6  ;;  %v4072_v57 = vld [vmem:[#allocation9 + $0x18] sm:$0xff]   ;;  %v4046_v6 = vld [vmem:[#allocation8 + $0x188] sm:$0xff]  }
 0x241   : > { %3577 = vmatprep.subr.bf16.mxu0 %v4024_v1 }
 0x244   : > { %3578 = vmatpush3.bf16.msra.mxu0 %v4024_v1  ;;  %v4045_v1 = vld [vmem:[#allocation8 + $0x180] sm:$0xff]  }
 0x245   : > { %3579 = vmatprep.subr.bf16.mxu0 %v4025_v7 }
 0x248   : > { %3580 = vmatpush3.bf16.msra.mxu0 %v4025_v7  ;;  %v4047_v7 = vld [vmem:[#allocation8 + $0x190] sm:$0xff]  }
 0x249   : > { %3581 = vmatprep.subr.bf16.mxu0 %v4026_v8 }
 0x24c   : > { %3582 = vmatpush3.bf16.msra.mxu0 %v4026_v8  ;;  %v4048_v8 = vld [vmem:[#allocation8 + $0x198] sm:$0xff]  }
 0x24d   : > { %3583 = vmatprep.subr.bf16.mxu0 %v4027_v48 }
 0x250   : > { %3584 = vmatpush3.bf16.msra.mxu0 %v4027_v48  ;;  %v4049_v48 = vld [vmem:[#allocation8 + $0x1a0] sm:$0xff]  }
 0x251   : > { %3585 = vmatprep.subr.bf16.mxu0 %v4028_v5 }
 0x254   : > { %3586 = vmatpush3.bf16.msra.mxu0 %v4028_v5  ;;  %v4052_v5 = vld [vmem:[#allocation8 + $0x1b8] sm:$0xff]  }
 0x255   : > { %3595 = vmatprep.subr.bf16.mxu0 %v4029_v9 }
 0x257   : > { %3588 = vmatmul.mubr.bf16.vlgmr.msra.gmra.mrb[0].mxu0 %v1646_v21  ;;  %v4060_v21 = vld [vmem:[#allocation8 + $0x1f8] sm:$0xff]  }
 0x258   : > { %3591 = vmatprep.mubr.bf16.mxu0 %v1647_v23  ;;  %3596 = vmatpush3.bf16.msra.mxu0 %v4029_v9  ;;  %v4053_v9 = vld [vmem:[#allocation8 + $0x1c0] sm:$0xff]   ;;  %v4062_v23 = vld [vmem:[#allocation8 + $0x208] sm:$0xff]  }
 0x259   : > { %3597 = vmatprep.subr.bf16.mxu0 %v4030_v22 }
 0x25c   : > { %3598 = vmatpush3.bf16.msra.mxu0 %v4030_v22 }
 0x25d   : > { %3599 = vmatprep.subr.bf16.mxu0 %v4031_v25 }
 0x25f   : > { %3592 = vmatmul.mubr.bf16.gmra.mrb[4].mxu0 %v1648_v28  ;;  %v4068_v28 = vld [vmem:[#allocation8 + $0x238] sm:$0xff]  }
 0x260   : > { %3600 = vmatpush3.bf16.msra.mxu0 %v4031_v25  ;;  %3611 = vmatprep.mubr.bf16.mxu0 %v4738_v54  ;;  %v4039_v54 = vld [vmem:[#allocation8 + $0x150] sm:$0xff]  }
 0x261   : > { %3601 = vmatprep.subr.bf16.mxu0 %v4032_v29  ;;  %v4063_v25 = vld [vmem:[#allocation8 + $0x210] sm:$0xff]  }
 0x264   : > { %3602 = vmatpush3.bf16.msra.mxu0 %v4032_v29 }
 0x265   : > { %3603 = vmatprep.subr.bf16.mxu0 %v4033_v30 }
 0x268   : > { %3604 = vmatpush3.bf16.msra.mxu0 %v4033_v30 }
 0x269   : > { %3605 = vmatprep.subr.bf16.mxu0 %v4034_v33 }
 0x26c   : > { %3606 = vmatpush3.bf16.msra.mxu0 %v4034_v33 }
 0x26d   : > { %3607 = vmatprep.subr.bf16.mxu0 %v4035_v36 }
 0x270   : > { %3608 = vmatpush3.bf16.msra.mxu0 %v4035_v36 }
 0x271   : > { %3609 = vmatprep.subr.bf16.mxu0 %v4036_v38 }
 0x274   : > { %3610 = vmatpush3.bf16.msra.mxu0 %v4036_v38 }
 0x275   : > { %3619 = vmatprep.subr.bf16.mxu0 %v4037_v43 }
 0x277   : > { %3612 = vmatmul.mubr.bf16.vlgmr.msra.gmra.mrb[0].mxu0 %v4736_v52  ;;  %v4071_v52 = vld [vmem:[#allocation9 + $0x10] sm:$0xff]  }
 0x278   : > { %3615 = vmatprep.mubr.bf16.mxu0 %v4746_v4  ;;  %3620 = vmatpush3.bf16.msra.mxu0 %v4037_v43  ;;  %v4042_v4 = vld [vmem:[#allocation8 + $0x168] sm:$0xff]  }
 0x279   : > { %3621 = vmatprep.subr.bf16.mxu0 %v4038_v47  ;;  %3719 = vmatprep.subr.bf16.mxu1 %v4071_v52 }
 0x27a   : > { %3720 = vmatpush3.bf16.msra.mxu1 %v4071_v52 }
 0x27b   : > { %3721 = vmatprep.subr.bf16.mxu1 %v4072_v57 }
 0x27c   : > { %3622 = vmatpush3.bf16.msra.mxu0 %v4038_v47 }
 0x27d   : > { %3623 = vmatprep.subr.bf16.mxu0 %v4039_v54 }
 0x27e   : > { %3722 = vmatpush3.bf16.msra.mxu1 %v4072_v57 }
 0x27f   : > { %3616 = vmatmul.mubr.bf16.gmra.mrb[4].mxu0 %v4744_v3  ;;  %v4043_v3 = vld [vmem:[#allocation8 + $0x170] sm:$0xff]   ;;  %3723 = vmatprep.subr.bf16.mxu1 %v4073_v58 }
 0x280   : > { %3624 = vmatpush3.bf16.msra.mxu0 %v4039_v54  ;;  %3635 = vmatprep.mubr.bf16.mxu0 %v4754_v19  ;;  %v4044_v19 = vld [vmem:[#allocation8 + $0x178] sm:$0xff]  }
 0x281   : > { %3625 = vmatprep.subr.bf16.mxu0 %v4040_v49 }
 0x282   : > { %3724 = vmatpush3.bf16.msra.mxu1 %v4073_v58 }
 0x283   : > { %3725 = vmatprep.subr.bf16.mxu1 %v4074_v63 }
 0x284   : > { %3626 = vmatpush3.bf16.msra.mxu0 %v4040_v49 }
 0x285   : > { %3627 = vmatprep.subr.bf16.mxu0 %v4041_v55 }
 0x286   : > { %3726 = vmatpush3.bf16.msra.mxu1 %v4074_v63  ;;  %v4079_v63 = vld [vmem:[#allocation11 + $0x10] sm:$0xff]  }
 0x288   : > { %3628 = vmatpush3.bf16.msra.mxu0 %v4041_v55 }
 0x289   : > { %3629 = vmatprep.subr.bf16.mxu0 %v4042_v4 }
 0x28c   : > { %3630 = vmatpush3.bf16.msra.mxu0 %v4042_v4 }
 0x28d   : > { %3631 = vmatprep.subr.bf16.mxu0 %v4043_v3 }
 0x290   : > { %3632 = vmatpush3.bf16.msra.mxu0 %v4043_v3 }
 0x291   : > { %3633 = vmatprep.subr.bf16.mxu0 %v4044_v19 }
 0x294   : > { %3634 = vmatpush3.bf16.msra.mxu0 %v4044_v19 }
 0x295   : > { %3643 = vmatprep.subr.bf16.mxu0 %v4045_v1 }
 0x297   : > { %3636 = vmatmul.mubr.bf16.vlgmr.msra.gmra.mrb[0].mxu0 %v4752_v17  ;;  %v4050_v17 = vld [vmem:[#allocation8 + $0x1a8] sm:$0xff]  }
 0x298   : > { %3639 = vmatprep.mubr.bf16.mxu0 %v4762_v32  ;;  %3644 = vmatpush3.bf16.msra.mxu0 %v4045_v1  ;;  %v4051_v32 = vld [vmem:[#allocation8 + $0x1b0] sm:$0xff]   ;;  %v3174_v1 = vld [vmem:[%s4624_s22 + $0x8] sm:$0xff] }
 0x299   : > { %3645 = vmatprep.subr.bf16.mxu0 %v4046_v6 }
 0x29c   : > { %3646 = vmatpush3.bf16.msra.mxu0 %v4046_v6  ;;  %v3175_v6 = vld [vmem:[%s4624_s22 + $0x10] sm:$0xff] }
 0x29d   : > { %3647 = vmatprep.subr.bf16.mxu0 %v4047_v7 }
 0x29f   : > { %3640 = vmatmul.mubr.bf16.gmra.mrb[4].mxu0 %v4760_v31  ;;  %v4054_v31 = vld [vmem:[#allocation8 + $0x1c8] sm:$0xff]  }
 0x2a0   : > { %3648 = vmatpush3.bf16.msra.mxu0 %v4047_v7  ;;  %3659 = vmatprep.mubr.bf16.mxu0 %v2096_v0 }
 0x2a1   : > { %3649 = vmatprep.subr.bf16.mxu0 %v4048_v8 }
 0x2a4   : > { %3650 = vmatpush3.bf16.msra.mxu0 %v4048_v8 }
 0x2a5   : > { %3651 = vmatprep.subr.bf16.mxu0 %v4049_v48 }
 0x2a8   : > { %3652 = vmatpush3.bf16.msra.mxu0 %v4049_v48 }
 0x2a9   : > { %3653 = vmatprep.subr.bf16.mxu0 %v4050_v17 }
 0x2ac   : > { %3654 = vmatpush3.bf16.msra.mxu0 %v4050_v17 }
 0x2ad   : > { %3655 = vmatprep.subr.bf16.mxu0 %v4051_v32 }
 0x2b0   : > { %3656 = vmatpush3.bf16.msra.mxu0 %v4051_v32  ;;  %v2702_v32 = vpack.c.bf16 %v3175_v6, %v3174_v1 }
 0x2b1   : > { %3657 = vmatprep.subr.bf16.mxu0 %v4052_v5 }
 0x2b4   : > { %3658 = vmatpush3.bf16.msra.mxu0 %v4052_v5  ;;  %v4080_v5 = vld [vmem:[#allocation11 + $0x18] sm:$0xff]  }
 0x2b5   : > { %3667 = vmatprep.subr.bf16.mxu0 %v4053_v9 }
 0x2b7   : > { %3660 = vmatmul.mubr.bf16.vlgmr.msra.gmra.mrb[0].mxu0 %v2097_v18  ;;  %v4057_v18 = vld [vmem:[#allocation8 + $0x1e0] sm:$0xff]  }
 0x2b8   : > { %3663 = vmatprep.mubr.bf16.mxu0 %v2098_v37  ;;  %3668 = vmatpush3.bf16.msra.mxu0 %v4053_v9  ;;  %v4081_v9 = vld [vmem:[#allocation11 + $0x20] sm:$0xff]  }
 0x2b9   : > { %3669 = vmatprep.subr.bf16.mxu0 %v4054_v31 }
 0x2ba   : > { %v4875_v0 = vpop.f32.mrb[56].mxu1 }
 0x2bb   : > { %v4877_v11 = vpop.f32.mrb[57].mxu1 }
 0x2bc   : > { %3670 = vmatpush3.bf16.msra.mxu0 %v4054_v31  ;;  %v4879_v12 = vpop.f32.mrb[58].mxu1  ;;  %v4082_v31 = vld [vmem:[#allocation11 + $0x28] sm:$0xff]  }
 0x2bd   : > { %3671 = vmatprep.subr.bf16.mxu0 %v4055_v46  ;;  %v4882_v15 = vpop.f32.mrb[59].mxu1 }
 0x2bf   : > { %3664 = vmatmul.mubr.bf16.gmra.mrb[4].mxu0 %v2099_v13  ;;  %v3179_v13 = vld [vmem:[%s4624_s22 + $0x30] sm:$0xff] }
 0x2c0   : > { %3672 = vmatpush3.bf16.msra.mxu0 %v4055_v46  ;;  %3683 = vmatprep.mubr.bf16.mxu0 %v4770_v53  ;;  %v4061_v53 = vld [vmem:[#allocation8 + $0x200] sm:$0xff]   ;;  %v4083_v46 = vld [vmem:[#allocation11 + $0x30] sm:$0xff]  }
 0x2c1   : > { %3673 = vmatprep.subr.bf16.mxu0 %v4056_v62 }
 0x2c4   : > { %3674 = vmatpush3.bf16.msra.mxu0 %v4056_v62 }
 0x2c5   : > { %3675 = vmatprep.subr.bf16.mxu0 %v4057_v18 }
 0x2c8   : > { %3676 = vmatpush3.bf16.msra.mxu0 %v4057_v18  ;;  %v3180_v18 = vld [vmem:[%s4624_s22 + $0x38] sm:$0xff] }
 0x2c9   : > { %3677 = vmatprep.subr.bf16.mxu0 %v4058_v39 }
 0x2ca   : > { %v4885_v37 = vpop.f32.mrb[60].mxu1 }
 0x2cb   : > { %v4887_v16 = vpop.f32.mrb[61].mxu1 }
 0x2cc   : > { %3678 = vmatpush3.bf16.msra.mxu0 %v4058_v39  ;;  %v4889_v42 = vpop.f32.mrb[62].mxu1  ;;  %v3181_v39 = vld [vmem:[%s4624_s22 + $0x40] sm:$0xff] }
 0x2cd   : > { %3679 = vmatprep.subr.bf16.mxu0 %v4059_v35  ;;  %v4891_v22 = vpop.f32.mrb[63].mxu1 }
 0x2d0   : > { %3680 = vmatpush3.bf16.msra.mxu0 %v4059_v35  ;;  %v2705_v35 = vpack.c.bf16 %v3181_v39, %v3180_v18 }
 0x2d1   : > { %3681 = vmatprep.subr.bf16.mxu0 %v4060_v21 }
 0x2d4   : > { %3682 = vmatpush3.bf16.msra.mxu0 %v4060_v21 }
 0x2d5   : > { %3691 = vmatprep.subr.bf16.mxu0 %v4061_v53 }
 0x2d7   : > { %3684 = vmatmul.mubr.bf16.vlgmr.msra.gmra.mrb[0].mxu0 %v4774_v2  ;;  %v4066_v2 = vld [vmem:[#allocation8 + $0x228] sm:$0xff]  }
 0x2d8   : > { %3687 = vmatprep.mubr.bf16.mxu0 %v4778_v14  ;;  %3692 = vmatpush3.bf16.msra.mxu0 %v4061_v53  ;;  %v4067_v14 = vld [vmem:[#allocation8 + $0x230] sm:$0xff]  }
 0x2d9   : > { %3693 = vmatprep.subr.bf16.mxu0 %v4062_v23 }
 0x2dc   : > { %3694 = vmatpush3.bf16.msra.mxu0 %v4062_v23 }
 0x2dd   : > { %3695 = vmatprep.subr.bf16.mxu0 %v4063_v25 }
 0x2df   : > { %3688 = vmatmul.mubr.bf16.gmra.mrb[4].mxu0 %v4781_v24  ;;  %v4075_v24 = vld [vmem:[#allocation9 + $0x30] sm:$0xff]  }
 0x2e0   : > { %3696 = vmatpush3.bf16.msra.mxu0 %v4063_v25  ;;  %3707 = vmatprep.mubr.bf16.mxu0 %v2397_v45 }
 0x2e1   : > { %3697 = vmatprep.subr.bf16.mxu0 %v4064_v26  ;;  %3727 = vmatprep.subr.bf16.mxu1 %v4075_v24 }
 0x2e2   : > { %3728 = vmatpush3.bf16.msra.mxu1 %v4075_v24 }
 0x2e3   : > { %3729 = vmatprep.subr.bf16.mxu1 %v4076_v34 }
 0x2e4   : > { %3698 = vmatpush3.bf16.msra.mxu0 %v4064_v26 }
 0x2e5   : > { %3699 = vmatprep.subr.bf16.mxu0 %v4065_v27 }
 0x2e6   : > { %3730 = vmatpush3.bf16.msra.mxu1 %v4076_v34 }
 0x2e7   : > { %3739 = vmatprep.subr.bf16.mxu1 %v4077_v41 }
 0x2e8   : > { %3700 = vmatpush3.bf16.msra.mxu0 %v4065_v27 }
 0x2e9   : > { %3701 = vmatprep.subr.bf16.mxu0 %v4066_v2 }
 0x2ec   : > { %3702 = vmatpush3.bf16.msra.mxu0 %v4066_v2 }
 0x2ed   : > { %3703 = vmatprep.subr.bf16.mxu0 %v4067_v14 }
 0x2f0   : > { %3704 = vmatpush3.bf16.msra.mxu0 %v4067_v14 }
 0x2f1   : > { %3705 = vmatprep.subr.bf16.mxu0 %v4068_v28 }
 0x2f4   : > { %3706 = vmatpush3.bf16.msra.mxu0 %v4068_v28 }
 0x2f7   : > { %3708 = vmatmul.mubr.bf16.vlgmr.msra.gmra.mrb[0].mxu0 %v2398_v61 }
 0x2f8   : > { %3711 = vmatprep.mubr.bf16.mxu0 %v2399_v20 }
 0x2ff   : > { %3712 = vmatmul.mubr.bf16.gmra.mrb[4].mxu0 %v4848_v40 }
 0x3ca   : > { %v3709_v45 = vpop.f32.mrb[0].mxu0 }
 0x3cb   : > { %v3763_v29 = vadd.f32 %v3709_v45, %v4875_v0  ;;  %v2500_v30 = vpop.f32.mrb[1].mxu0  ;;  %v3176_v0 = vld [vmem:[%s4624_s22 + $0x18] sm:$0xff] }
 0x3cc   : > { %v3764_v56 = vadd.f32 %v2500_v30, %v4877_v11  ;;  %v3710_v60 = vpop.f32.mrb[2].mxu0  ;;  %v3177_v11 = vld [vmem:[%s4624_s22 + $0x20] sm:$0xff] }
 0x3cd   : > { %v3765_v61 = vadd.f32 %v3710_v60, %v4879_v12  ;;  %v2503_v10 = vpop.f32.mrb[3].mxu0  ;;  %v2548_v40 = vadd.f32 %v3763_v29, %v3164_v44  ;;  %v3178_v12 = vld [vmem:[%s4624_s22 + $0x28] sm:$0xff]  ;;  %v2703_v62 = vpack.c.bf16 %v3177_v11, %v3176_v0 }
 0x3ce   : > { %v3766_v20 = vadd.f32 %v2503_v10, %v4882_v15  ;;  %v2546_v36 = vadd.f32 %v3764_v56, %v3164_v44  ;;  %v2704_v15 = vpack.c.bf16 %v3179_v13, %v3178_v12 }
 0x3cf   : > { %v2549_v33 = vadd.f32 %v3765_v61, %v3164_v44 }
 0x3d0   : > { %v2547_v38 = vadd.f32 %v3766_v20, %v3164_v44 }
 0x3d1   : > { %v2555_v43 = vpack.c.bf16 %v2549_v33, %v2548_v40 }
 0x3d2   : > { %v3713_v47 = vpop.f32.mrb[4].mxu0  ;;  %v2554_v54 = vpack.c.bf16 %v2547_v38, %v2546_v36 }
 0x3d3   : > { %v3767_v49 = vadd.f32 %v3713_v47, %v4885_v37  ;;  %v2516_v50 = vpop.f32.mrb[5].mxu0  ;;  %v3165_v37 = vld [vmem:[%s5023_s28] ss:$0 sm:$0xff]  ;;  %s4231_s28 = sshll.u32 %s4330_s23, 4  ;;  %s4232_s28 = int_to_ptr.vmem [resolvable:$false] %s4231_s28 }
 0x3d4   : > { %v3768_v55 = vadd.f32 %v2516_v50, %v4887_v16  ;;  %v3714_v52 = vpop.f32.mrb[6].mxu0  ;;  %3731 = vmatprep.mubr.bf16.mxu1 %v2554_v54  ;;  %v3182_v16 = vld [vmem:[%s5024_s18] ss:$0 sm:$0xff]  ;;  %s4233_s16 = scalar_lea.vmem %s4232_s28, 2048  ;;  %p4234_p3 = scmp.lt.s32.totalorder %s4933_s12, %s4232_s28 }
 0x3d5   : > { %v3769_v4 = vadd.f32 %v3714_v52, %v4889_v42  ;;  %v2519_v57 = vpop.f32.mrb[7].mxu0  ;;  %3732 = vmatmul.mubr.bf16.vlgmr.msra.gmra.mrb[64].mxu1 %v2555_v43  ;;  %v2552_v58 = vadd.f32 %v3767_v49, %v3164_v44  ;;  %v3777_v42 = vadd.f32 %v3182_v16, %v3165_v37  ;;  %p4235_p7 = scmp.lt.s32.totalorder %s4233_s16, %s4227_s27 }
 0x3d6   : > { %v3770_v3 = vadd.f32 %v2519_v57, %v4891_v22  ;;  %3740 = vmatpush3.bf16.msra.mxu1 %v4077_v41  ;;  %v2550_v7 = vadd.f32 %v3768_v55, %v3164_v44 }
 0x3d7   : > { %v2553_v19 = vadd.f32 %v3769_v4, %v3164_v44  ;;  %3741 = vmatprep.subr.bf16.mxu1 %v4078_v51  ;;  %p4236_p9 = por %p4235_p7, %p4234_p3 }
 0x3d8   : > { %v2551_v8 = vadd.f32 %v3770_v3, %v3164_v44 }
 0x3d9   : > { %v2557_v48 = vpack.c.bf16 %v2553_v19, %v2552_v58  ;;  %p4237_p0 = pnand %p4236_p9, %p4230_p10 }
 0x3da   : > { %3742 = vmatpush3.bf16.msra.mxu1 %v4078_v51  ;;  %v2556_v17 = vpack.c.bf16 %v2551_v8, %v2550_v7 }
 0x3db   : > { %3743 = vmatprep.subr.bf16.mxu1 %v4079_v63 }
 0x3dc   : > { %3735 = vmatprep.mubr.bf16.mxu1 %v2556_v17 }
 0x3dd   : > { %3736 = vmatmul.mubr.bf16.gmra.mrb[68].mxu1 %v2557_v48 }
 0x3de   : > { %3744 = vmatpush3.bf16.msra.mxu1 %v4079_v63  ;;  %3755 = vmatprep.mubr.bf16.mxu1 %v2702_v32 }
 0x3df   : > { %3745 = vmatprep.subr.bf16.mxu1 %v4080_v5 }
 0x3e2   : > { %3746 = vmatpush3.bf16.msra.mxu1 %v4080_v5 }
 0x3e3   : > { %3747 = vmatprep.subr.bf16.mxu1 %v4081_v9 }
 0x3e6   : > { %3748 = vmatpush3.bf16.msra.mxu1 %v4081_v9 }
 0x3e7   : > { %3749 = vmatprep.subr.bf16.mxu1 %v4082_v31 }
 0x3ea   : > { %3750 = vmatpush3.bf16.msra.mxu1 %v4082_v31 }
 0x3eb   : > { %3751 = vmatprep.subr.bf16.mxu1 %v4083_v46 }
 0x3ee   : > { %3752 = vmatpush3.bf16.msra.mxu1 %v4083_v46 }
 0x3ef   : > { %3753 = vmatprep.subr.bf16.mxu1 %v4084_v59 }
 0x3f2   : > { %3754 = vmatpush3.bf16.msra.mxu1 %v4084_v59 }
 0x3f5   : > { %3756 = vmatmul.mubr.bf16.vlgmr.msra.gmra.mrb[64].mxu1 %v2703_v62 }
 0x3f6   : > { %3759 = vmatprep.mubr.bf16.mxu1 %v2704_v15 }
 0x3fd   : > { %3760 = vmatmul.mubr.bf16.gmra.mrb[68].mxu1 %v2705_v35 }
 0x4c8   : > { %v3757_v21 = vpop.f32.mrb[64].mxu1 }
 0x4c9   : > { %v3771_v22 = vadd.f32 %v3757_v21, %v3165_v37  ;;  %v2811_v53 = vpop.f32.mrb[65].mxu1 }
 0x4ca   : > { %v3773_v23 = vadd.f32 %v3165_v37, %v2811_v53  ;;  %v3758_v25 = vpop.f32.mrb[66].mxu1 }
 0x4cb   : > { %v3772_v26 = vadd.f32 %v3771_v22, %v3182_v16  ;;  %v3776_v27 = vadd.f32 %v3777_v42, %v3758_v25  ;;  %v2814_v2 = vpop.f32.mrb[67].mxu1 }
 0x4cc   : > { %v3774_v14 = vadd.f32 %v3773_v23, %v3182_v16  ;;  %v3778_v28 = vadd.f32 %v3777_v42, %v2814_v2 }
 0x4cd   : > { %v2852_v24 = vmax.f32 %v3772_v26, 0.0  ;;  %v2853_v34 = vmax.f32 %v3776_v27, 0.0 }
 0x4ce   : > { %v2850_v41 = vmax.f32 %v3774_v14, 0.0  ;;  %v2851_v45 = vmax.f32 %v3778_v28, 0.0 }
 0x4cf   : > { %2860 = vst [vmem:[%s426_s6 + $0x10] sm:$0xff] %v2852_v24  ;;  %2861 = vst [vmem:[%s426_s6 + $0x18] sm:$0xff] %v2853_v34 }
 0x4d0   : > { %2858 = vst [vmem:[%s426_s6] sm:$0xff] %v2850_v41  ;;  %2859 = vst [vmem:[%s426_s6 + $0x8] sm:$0xff] %v2851_v45  ;;  %v3761_v29 = vpop.f32.mrb[68].mxu1 }
 0x4d1   : > { %v3780_v30 = vadd.f32 %v3777_v42, %v3761_v29  ;;  %v2827_v44 = vpop.f32.mrb[69].mxu1 }
 0x4d2   : > { %v3782_v56 = vadd.f32 %v3777_v42, %v2827_v44  ;;  %v3762_v60 = vpop.f32.mrb[70].mxu1 }
 0x4d3   : > { %v2856_v61 = vmax.f32 %v3780_v30, 0.0  ;;  %v3784_v10 = vadd.f32 %v3777_v42, %v3762_v60  ;;  %v2830_v20 = vpop.f32.mrb[71].mxu1 }
 0x4d4   : > { %v2854_v40 = vmax.f32 %v3782_v56, 0.0  ;;  %v3786_v33 = vadd.f32 %v3777_v42, %v2830_v20 }
 0x4d5   : > { %2864 = vst [vmem:[%s426_s6 + $0x30] sm:$0xff] %v2856_v61  ;;  %v2857_v36 = vmax.f32 %v3784_v10, 0.0 }
 0x4d6   : > { %2862 = vst [vmem:[%s426_s6 + $0x20] sm:$0xff] %v2854_v40  ;;  %v2855_v38 = vmax.f32 %v3786_v33, 0.0 }
 0x4d7   : > { %2865 = vst [vmem:[%s426_s6 + $0x38] sm:$0xff] %v2857_v36 }
 0x4d8   : > { %2863 = vst [vmem:[%s426_s6 + $0x28] sm:$0xff] %v2855_v38 }
 0x4d9   : > { %4240 = shalt.err (!%p4237_p0)
}
 0x4da   : > { %s4241_s25 = scalar_lea.hbm %s4938_s21, 1024  ;;  %s4245_s26 = scalar_lea.hbm %s5026_s19, 2048 }
 0x4db   : > { %p4242_p4 = scmp.ne.s32.totalorder %s4938_s21, %s4241_s25  ;;  %p4246_p12 = scmp.lt.u32.totalorder %s4938_s21, %s5026_s19 }
 0x4dc   : > { %p4247_p1 = scmp.lt.u32.totalorder %s4245_s26, %s4241_s25  ;;  %p4249_p8 = scmp.lt.u32.totalorder %s4241_s25, %s4938_s21 }
 0x4dd   : > { %p4243_p13 = pnand %p4242_p4, %p4567_p5 }
 0x4de   : > { %p4248_p11 = por %p4247_p1, %p4246_p12 }
 0x4df   : > { %p4244_p2 = pneg %p4243_p13 }
 0x4e0   : > { %p4250_p6 = por %p4249_p8, %p4248_p11 }
 0x4e2   : > { %p4251_p10 = pnand %p4250_p6, %p4244_p2 }
 0x4e4   : > { %4254 = shalt.err (!%p4251_p10)
}
 0x4e5   : > { %s4331_s22 = smov 128   ;;  %s4332_s17 = smov 8  }
 0x4e6   : > { %3872 = dma.vmem_to_hbm [thread:$0]  (%p4567_p5), %s4933_s12, 1024, %s4938_s21, %s2867_s15, %s4331_s22, %s4331_s22, %s4332_s17  }
 0x4e7 PF: > { %s5027_s27 = sld [smem:[#allocation17_spill]]  ;;  %s5028_s23 = sld [smem:[#allocation19_spill]] }
 0x4e8   : > { %p5030_p7 = scmp.ge.s32.totalorder %s4317_s14, 2 }
 0x4ed   : > { %s2897_s28 = sand.u32 1, %s5027_s27   ;;  %p5029_p3 = scmp.ne.s32.totalorder %s5028_s23, 0 }
 0x4ee   : > { %s2898_s16 = scalar_lea.sflag [#allocation5], %s2897_s28 }
 0x4ef   : > { %p3892_p9 = pnand %p5030_p7, %p5029_p3 }
 0x4f1   : > { %4292 = dma.done.wait (!%p3892_p9), %s2898_s16, 1024  }
 0x4f2   : > { %4294 = vsyncadd (!%p3892_p9), %s2898_s16, 4294966272  ;;  %s27_s14 = sadd.s32 1, %s4317_s14   ;;  %s5031_s8 = smov %s5038_s30 }
 0x4f3   : > { %p24_p0 = scmp.ge.s32.totalorder %s27_s14, 4   ;;  %s5032_s30 = smov %s4301_s10 }
 0x4f4   : > { %s5033_s10 = smov %s4305_s11  ;;  %s5034_s11 = smov %s4579_s9 }
 0x4f5   : > { %s5035_s12 = smov %s4313_s13  ;;  %s5036_s13 = smov %s5031_s8 }
 0x4f6   :  { %26 = sbr.rel (!%p24_p0) target bundleno = 12 (0xc), region = 140 }
 0x4fd   :  { %2903 = vsyncpa [#allocation4], 1 }
 0x4fe   :  { %2905 = vsyncpa [#allocation4 + $0x1], 1 }
 0x4ff   :  { %2906 = vsyncpa [#allocation7], 1 }
 0x500   :  { %2907 = vsyncpa [#allocation10], 1 }
 0x501   :  { %2908 = vsyncpa [#allocation5], 1 }
 0x502   :  { %2910 = vsyncpa [#allocation5 + $0x1], 1 }

</bundles_post_ra>
